<compile_context>
chip_gen: v7x
topology: tpu7x:2x2x1
jax: 0.10.0
libtpu: 0.0.40
codegen_flags: <defaults>
</compile_context>

<pallas_src>
import functools

import jax
import jax.numpy as jnp
from jax import lax
from jax.experimental import pallas as pl
from jax.experimental.pallas import tpu as pltpu


# ---------------------------------------------------------------------------
# Recurrent kernel: one grid step == one (batch block, chunk of C timesteps).
# ---------------------------------------------------------------------------
def _lstm_chunk_kernel(gx_ref, whh_ref, h0_ref, c0_ref,
                       out_ref, cT_ref,
                       h_scr, c_scr,
                       *, seq_len, chunk, hidden, needs_mask, unroll):
    g = pl.program_id(1)  # chunk index (innermost, sequential per batch block)

    @pl.when(g == 0)
    def _():
        # New batch block starts: (re)load the carry from h0/c0.
        h_scr[...] = h0_ref[...]
        c_scr[...] = c0_ref[...]

    H = hidden
    mm_dtype = whh_ref.dtype  # bf16 (or f32) MXU input dtype

    def step(s, carry):
        h, c = carry
        # Recurrent projection only; the x @ W_ih + bias term was hoisted into
        # gx_ref.  bf16 matmul inputs, f32 accumulation; gate math stays f32.
        # W_hh is streamed from VMEM inside the loop (it cannot fit in vregs).
        gates = gx_ref[s] + jnp.dot(h.astype(mm_dtype), whh_ref[...],
                                    preferred_element_type=jnp.float32)
        i_g = jax.nn.sigmoid(gates[:, 0 * H:1 * H])
        f_g = jax.nn.sigmoid(gates[:, 1 * H:2 * H])
        g_g = jnp.tanh(gates[:, 2 * H:3 * H])
        o_g = jax.nn.sigmoid(gates[:, 3 * H:4 * H])

        c_new = f_g * c + i_g * g_g
        h_new = o_g * jnp.tanh(c_new)

        out_ref[s] = h_new

        if needs_mask:
            # Only when T was padded up to a chunk multiple: freeze the carry
            # past the true last step so cT is captured at t == T-1.
            valid = (g * chunk + s) < seq_len
            h_new = jnp.where(valid, h_new, h)
            c_new = jnp.where(valid, c_new, c)
        return h_new, c_new

    h_fin, c_fin = lax.fori_loop(0, chunk, step, (h_scr[...], c_scr[...]),
                                 unroll=unroll)
    h_scr[...] = h_fin
    c_scr[...] = c_fin

    @pl.when(g == pl.num_programs(1) - 1)
    def _():
        cT_ref[...] = c_fin


def _pick_blocks(T, B, H, max_chunk=16, vmem_budget_bytes=8 << 20):
    """Pick (batch block BB, n batch blocks, T chunk C, needs_mask).

    The budget bounds the double-buffered gates_x + out chunk blocks so the
    kernel fits every generation's scoped VMEM default (v7x: 64 MiB physical,
    32 MiB scoped).  Batch blocks stay multiples of 8 rows (sublane aligned);
    if B is not 8-aligned we fall back to a single full-batch block (legal,
    since full-extent dims are exempt from the (8,128) rule)."""
    def t_bytes(bb):                                # one timestep, both streams,
        return 2 * (4 * H + H) * bb * 4             # double-buffered, f32

    BB = B
    if BB % 16 == 0:
        BB //= 2                                    # expose 2-way megacore split
    while BB % 16 == 0 and t_bytes(BB) > vmem_budget_bytes:
        BB //= 2                                    # keep big batches in budget
    n_b = B // BB

    c_vmem = max(1, vmem_budget_bytes // t_bytes(BB))
    cmax = int(max(1, min(T, max_chunk, c_vmem)))
    best_div = max(c for c in range(1, cmax + 1) if T % c == 0)
    if best_div * 2 >= cmax:
        return BB, n_b, best_div, False             # no padded tail
    return BB, n_b, cmax, True                      # pad T up to a chunk multiple


def _lstm_recurrence(gates_x, w_hh_t, h0, c0, *, max_chunk=16):
    """gates_x: (T, B, 4H) f32 (input projection already applied).
       Returns out (T, B, H) f32 and cT (B, H) f32."""
    T, B, G4 = gates_x.shape
    H = h0.shape[-1]
    assert G4 == 4 * H

    BB, n_b, C, needs_mask = _pick_blocks(T, B, H, max_chunk=max_chunk)
    T_pad = int(pl.cdiv(T, C)) * C
    if T_pad != T:
        gates_x = jnp.pad(gates_x, ((0, T_pad - T), (0, 0), (0, 0)))
    num_chunks = T_pad // C

    kernel = functools.partial(
        _lstm_chunk_kernel,
        seq_len=T, chunk=C, hidden=H, needs_mask=needs_mask, unroll=True)

    # W_hh has a constant block index -> DMA'd once and kept resident; h0/c0/cT
    # follow the batch-block index so each block carries its own state.
    grid_spec = pltpu.PrefetchScalarGridSpec(
        num_scalar_prefetch=0,
        grid=(n_b, num_chunks),
        in_specs=[
            pl.BlockSpec((C, BB, 4 * H), lambda b, g: (g, b, 0)),   # gates_x chunk
            pl.BlockSpec((H, 4 * H), lambda b, g: (0, 0)),          # W_hh^T (resident)
            pl.BlockSpec((BB, H), lambda b, g: (b, 0)),             # h0 block
            pl.BlockSpec((BB, H), lambda b, g: (b, 0)),             # c0 block
        ],
        out_specs=[
            pl.BlockSpec((C, BB, H), lambda b, g: (g, b, 0)),       # out chunk
            pl.BlockSpec((BB, H), lambda b, g: (b, 0)),             # cT block
        ],
        scratch_shapes=[
            pltpu.VMEM((BB, H), jnp.float32),   # h carry
            pltpu.VMEM((BB, H), jnp.float32),   # c carry
        ],
    )

    out, cT = pl.pallas_call(
        kernel,
        out_shape=(jax.ShapeDtypeStruct((T_pad, B, H), jnp.float32),
                   jax.ShapeDtypeStruct((B, H), jnp.float32)),
        grid_spec=grid_spec,
        compiler_params=pltpu.CompilerParams(
            dimension_semantics=("parallel", "arbitrary"),
            vmem_limit_bytes=32 * 1024 * 1024),   # safe on v5e/v6e/v7x
    )(gates_x, w_hh_t, h0, c0)

    if T_pad != T:
        out = out[:T]
    return out, cT


@jax.jit
def lstm_forward(x, w_ih_t, w_hh_t, bias, h0, c0):
    """x: (T, B, I). Returns out (T, B, H), (hT, cT) each (B, H)."""
    T, B, I = x.shape
    H = h0.shape[-1]
    # Hoisted input projection: one big lane-dense MXU matmul (T*B rows),
    # off the sequential critical path.  bf16 inputs, f32 accumulation.
    gates_x = jnp.dot(x.reshape(T * B, I).astype(w_ih_t.dtype), w_ih_t,
                      preferred_element_type=jnp.float32)
    gates_x = gates_x.reshape(T, B, 4 * H) + bias      # bias broadcast, f32
    # Chunked sequential recurrence in Pallas.
    out, cT = _lstm_recurrence(gates_x, w_hh_t, h0, c0)
    hT = out[T - 1]                                    # hT duplicates out[-1]
    return out, (hT, cT)


# ---------------------------------------------------------------------------
# Module wrapper (mirror of the rsl-rl LSTMModule forward, num_layers=1)
# ---------------------------------------------------------------------------
class LSTMModule:
    def __init__(self, input_size, hidden_size=256, num_layers=1, key=None,
                 matmul_dtype=jnp.bfloat16):
        assert num_layers == 1, "kernel implements num_layers=1"
        self.input_size = input_size
        self.hidden_size = hidden_size
        if key is None:
            key = jax.random.PRNGKey(0)
        k1, k2, k3, k4 = jax.random.split(key, 4)
        bound = 1.0 / jnp.sqrt(hidden_size)
        # PyTorch nn.LSTM param shapes: weight_ih (4H, I), weight_hh (4H, H),
        # bias_ih (4H,), bias_hh (4H,).  Transposes stored, weights in bf16
        # (MXU input dtype); accumulation and gate math stay f32.
        w_ih = jax.random.uniform(k1, (4 * hidden_size, input_size),
                                  jnp.float32, -bound, bound)
        w_hh = jax.random.uniform(k2, (4 * hidden_size, hidden_size),
                                  jnp.float32, -bound, bound)
        b_ih = jax.random.uniform(k3, (4 * hidden_size,), jnp.float32, -bound, bound)
        b_hh = jax.random.uniform(k4, (4 * hidden_size,), jnp.float32, -bound, bound)
        self.w_ih_t = jnp.transpose(w_ih).astype(matmul_dtype)   # (I, 4H)
        self.w_hh_t = jnp.transpose(w_hh).astype(matmul_dtype)   # (H, 4H)
        self.bias = (b_ih + b_hh).astype(jnp.float32)            # (4H,)
        self.hidden_states = None

    def _zero_state(self, batch):
        z = jnp.zeros((batch, self.hidden_size), jnp.float32)
        return (z, z)

    def forward(self, inp, masks=None, hidden_states=None):
        batch_mode = masks is not None
        if batch_mode:
            if hidden_states is None:
                raise ValueError(
                    'Hidden states not passed to memory module during policy update')
            h0, c0 = hidden_states
            out, _ = lstm_forward(inp, self.w_ih_t, self.w_hh_t, self.bias, h0, c0)
            # TODO(synk): unpad_trajectories(out, masks) is rsl-rl glue (gather by
            # mask), not part of the LSTM hot path; returning padded output here.
            return out
        else:
            # inference mode: inp is (B, I) -> seq dim of 1
            x = inp[None, ...]
            if self.hidden_states is None:
                self.hidden_states = self._zero_state(inp.shape[0])
            h0, c0 = self.hidden_states
            out, self.hidden_states = lstm_forward(
                x, self.w_ih_t, self.w_hh_t, self.bias, h0, c0)
            return out

    __call__ = forward

    def reset(self, dones=None):
        if self.hidden_states is None or dones is None:
            return
        h, c = self.hidden_states
        self.hidden_states = (h.at[dones].set(0.0), c.at[dones].set(0.0))


# ---------------------------------------------------------------------------
# Pure-JAX reference (same bf16-in / f32-accum arithmetic) for correctness.
# ---------------------------------------------------------------------------
def _lstm_reference(x, w_ih_t, w_hh_t, bias, h0, c0):
    T, B, I = x.shape
    H = h0.shape[-1]
    gates_x = jnp.dot(x.reshape(T * B, I).astype(w_ih_t.dtype), w_ih_t,
                      preferred_element_type=jnp.float32)
    gates_x = gates_x.reshape(T, B, 4 * H) + bias

    def step(carry, gx_t):
        h, c = carry
        gates = gx_t + jnp.dot(h.astype(w_hh_t.dtype), w_hh_t,
                               preferred_element_type=jnp.float32)
        i = jax.nn.sigmoid(gates[:, 0 * H:1 * H])
        f = jax.nn.sigmoid(gates[:, 1 * H:2 * H])
        g = jnp.tanh(gates[:, 2 * H:3 * H])
        o = jax.nn.sigmoid(gates[:, 3 * H:4 * H])
        c_new = f * c + i * g
        h_new = o * jnp.tanh(c_new)
        return (h_new, c_new), h_new

    (hT, cT), out = lax.scan(step, (h0, c0), gates_x)
    return out, (hT, cT)


if __name__ == "__main__":
    key = jax.random.PRNGKey(0)
    k_mod, k_x, k_h, k_c = jax.random.split(key, 4)

    # Small but lane/sublane-aligned shapes (B multiple of 8, H multiple of 128)
    T, B, I, H = 8, 8, 32, 128
    module = LSTMModule(input_size=I, hidden_size=H, num_layers=1, key=k_mod)

    # batch ("policy update") mode: full sequence with provided hidden states
    x_seq = jax.random.normal(k_x, (T, B, I), jnp.float32)
    h0 = jax.random.normal(k_h, (B, H), jnp.float32)
    c0 = jax.random.normal(k_c, (B, H), jnp.float32)
    masks = jnp.ones((T, B), jnp.float32)

    out_seq = module(x_seq, masks=masks, hidden_states=(h0, c0))
    out_seq = jax.block_until_ready(out_seq)

    # inference mode: single step, module-managed hidden state
    out_step = module(x_seq[0])
    out_step = jax.block_until_ready(out_step)

    # sanity check against a pure-JAX reference (same arithmetic)
    ref_out, (ref_h, ref_c) = _lstm_reference(
        x_seq, module.w_ih_t, module.w_hh_t, module.bias, h0, c0)
    out_k, (hT_k, cT_k) = lstm_forward(
        x_seq, module.w_ih_t, module.w_hh_t, module.bias, h0, c0)
    jax.block_until_ready((out_k, hT_k, cT_k))

    # also exercise a batch-tiled configuration (B=32 -> 2 batch blocks)
    B2 = 32
    kx2, kh2, kc2 = jax.random.split(jax.random.PRNGKey(1), 3)
    x2 = jax.random.normal(kx2, (T, B2, I), jnp.float32)
    h2 = jax.random.normal(kh2, (B2, H), jnp.float32)
    c2 = jax.random.normal(kc2, (B2, H), jnp.float32)
    out2, (h2T, c2T) = lstm_forward(
        x2, module.w_ih_t, module.w_hh_t, module.bias, h2, c2)
    ref2, (rh2, rc2) = _lstm_reference(
        x2, module.w_ih_t, module.w_hh_t, module.bias, h2, c2)
    jax.block_until_ready((out2, h2T, c2T))

    assert out_seq.shape == (T, B, H)
    assert out_step.shape == (1, B, H)
    assert jnp.allclose(out_seq, ref_out, atol=5e-4, rtol=5e-4)
    assert jnp.allclose(hT_k, ref_h, atol=5e-4, rtol=5e-4)
    assert jnp.allclose(cT_k, ref_c, atol=5e-4, rtol=5e-4)
    assert jnp.allclose(out2, ref2, atol=5e-4, rtol=5e-4)
    assert jnp.allclose(h2T, rh2, atol=5e-4, rtol=5e-4)
    assert jnp.allclose(c2T, rc2, atol=5e-4, rtol=5e-4)

    print("KERNEL_OK")
</pallas_src>

<mosaic_0001>
module attributes {stable_mosaic.version = 11 : i64} {
  func.func @_lstm_chunk_kernel(%arg0: i32, %arg1: i32, %arg2: memref<8x8x512xf32, #tpu.memory_space<vmem>>, %arg3: memref<128x512xbf16, #tpu.memory_space<vmem>>, %arg4: memref<8x128xf32, #tpu.memory_space<vmem>>, %arg5: memref<8x128xf32, #tpu.memory_space<vmem>>, %arg6: memref<8x8x128xf32, #tpu.memory_space<vmem>>, %arg7: memref<8x128xf32, #tpu.memory_space<vmem>>, %arg8: memref<8x128xf32, #tpu.memory_space<vmem>>, %arg9: memref<8x128xf32, #tpu.memory_space<vmem>>) attributes {dimension_semantics = [#tpu.dimension_semantics<parallel>, #tpu.dimension_semantics<arbitrary>], iteration_bounds = array<i64: 1, 1>, scalar_prefetch = 0 : i64, scratch_operands = 2 : i64, tpu.core_type = #tpu.core_type<tc>, window_params = [{transform_indices = @transform_0, window_bounds = array<i64: 8, 8, 512>}, {pipeline_mode = #tpu.pipeline_mode<synchronous>, transform_indices = @transform_1, window_bounds = array<i64: 128, 512>}, {transform_indices = @transform_2, window_bounds = array<i64: 8, 128>}, {transform_indices = @transform_3, window_bounds = array<i64: 8, 128>}, {transform_indices = @transform_4, window_bounds = array<i64: 8, 8, 128>}, {transform_indices = @transform_5, window_bounds = array<i64: 8, 128>}]} {
    %c0_i32 = arith.constant 0 : i32
    %0 = arith.cmpi eq, %arg1, %c0_i32 : i32
    %1 = arith.extui %0 : i1 to i32
    %c0_i32_0 = arith.constant 0 : i32
    %2 = arith.cmpi ne, %1, %c0_i32_0 : i32
    scf.if %2 {
      %c0_90 = arith.constant 0 : index
      %c0_91 = arith.constant 0 : index
      %298 = vector.load %arg4[%c0_90, %c0_91] : memref<8x128xf32, #tpu.memory_space<vmem>>, vector<8x128xf32>
      %c0_92 = arith.constant 0 : index
      %c0_93 = arith.constant 0 : index
      %299 = vector.load %arg8[%c0_92, %c0_93] : memref<8x128xf32, #tpu.memory_space<vmem>>, vector<8x128xf32>
      tpu.vector_store %arg8[%c0_92, %c0_93], %298 {strides = array<i32>} : memref<8x128xf32, #tpu.memory_space<vmem>>, vector<8x128xf32>,
      %c0_94 = arith.constant 0 : index
      %c0_95 = arith.constant 0 : index
      %300 = vector.load %arg5[%c0_94, %c0_95] : memref<8x128xf32, #tpu.memory_space<vmem>>, vector<8x128xf32>
      %c0_96 = arith.constant 0 : index
      %c0_97 = arith.constant 0 : index
      %301 = vector.load %arg9[%c0_96, %c0_97] : memref<8x128xf32, #tpu.memory_space<vmem>>, vector<8x128xf32>
      tpu.vector_store %arg9[%c0_96, %c0_97], %300 {strides = array<i32>} : memref<8x128xf32, #tpu.memory_space<vmem>>, vector<8x128xf32>,
    } else {
    }
    %c0 = arith.constant 0 : index
    %c0_1 = arith.constant 0 : index
    %3 = vector.load %arg8[%c0, %c0_1] : memref<8x128xf32, #tpu.memory_space<vmem>>, vector<8x128xf32>
    %c0_2 = arith.constant 0 : index
    %c0_3 = arith.constant 0 : index
    %4 = vector.load %arg9[%c0_2, %c0_3] : memref<8x128xf32, #tpu.memory_space<vmem>>, vector<8x128xf32>
    %c0_i32_4 = arith.constant 0 : i32
    %5 = arith.index_cast %c0_i32_4 : i32 to index
    %c0_5 = arith.constant 0 : index
    %c0_6 = arith.constant 0 : index
    %6 = vector.load %arg2[%5, %c0_5, %c0_6] : memref<8x8x512xf32, #tpu.memory_space<vmem>>, vector<1x8x512xf32>
    %7 = vector.shape_cast %6 : vector<1x8x512xf32> to vector<8x512xf32>
    %8 = arith.truncf %3 : vector<8x128xf32> to vector<8x128xbf16>
    %c0_7 = arith.constant 0 : index
    %c0_8 = arith.constant 0 : index
    %9 = vector.load %arg3[%c0_7, %c0_8] : memref<128x512xbf16, #tpu.memory_space<vmem>>, vector<128x512xbf16>
    %cst = arith.constant dense<0.000000e+00> : vector<8x512xf32>
    %10 = tpu.matmul %8, %9, %cst {dimension_numbers = #tpu.dot_dimension_numbers<[1], [0], [0], [1], [0, 0, 1, 1], [], []>} : vector<8x128xbf16>, vector<128x512xbf16>, vector<8x512xf32> -> vector<8x512xf32>
    %11 = arith.addf %7, %10 : vector<8x512xf32>
    %12 = vector.extract_strided_slice %11 {offsets = [0, 0], sizes = [8, 128], strides = [1, 1]} : vector<8x512xf32> to vector<8x128xf32>
    %13 = arith.negf %12 : vector<8x128xf32>
    %14 = math.exp %13 : vector<8x128xf32>
    %cst_9 = arith.constant 1.000000e+00 : f32
    %15 = vector.broadcast %cst_9 : f32 to vector<8x128xf32>
    %16 = arith.addf %15, %14 : vector<8x128xf32>
    %17 = arith.divf %15, %16 : vector<8x128xf32>
    %18 = vector.extract_strided_slice %11 {offsets = [0, 128], sizes = [8, 128], strides = [1, 1]} : vector<8x512xf32> to vector<8x128xf32>
    %19 = arith.negf %18 : vector<8x128xf32>
    %20 = math.exp %19 : vector<8x128xf32>
    %cst_10 = arith.constant 1.000000e+00 : f32
    %21 = vector.broadcast %cst_10 : f32 to vector<8x128xf32>
    %22 = arith.addf %21, %20 : vector<8x128xf32>
    %23 = arith.divf %21, %22 : vector<8x128xf32>
    %24 = vector.extract_strided_slice %11 {offsets = [0, 256], sizes = [8, 128], strides = [1, 1]} : vector<8x512xf32> to vector<8x128xf32>
    %25 = math.tanh %24 : vector<8x128xf32>
    %26 = vector.extract_strided_slice %11 {offsets = [0, 384], sizes = [8, 128], strides = [1, 1]} : vector<8x512xf32> to vector<8x128xf32>
    %27 = arith.negf %26 : vector<8x128xf32>
    %28 = math.exp %27 : vector<8x128xf32>
    %cst_11 = arith.constant 1.000000e+00 : f32
    %29 = vector.broadcast %cst_11 : f32 to vector<8x128xf32>
    %30 = arith.addf %29, %28 : vector<8x128xf32>
    %31 = arith.divf %29, %30 : vector<8x128xf32>
    %32 = arith.mulf %23, %4 : vector<8x128xf32>
    %33 = arith.mulf %17, %25 : vector<8x128xf32>
    %34 = arith.addf %32, %33 : vector<8x128xf32>
    %35 = math.tanh %34 : vector<8x128xf32>
    %36 = arith.mulf %31, %35 : vector<8x128xf32>
    %37 = arith.index_cast %c0_i32_4 : i32 to index
    %c0_12 = arith.constant 0 : index
    %c0_13 = arith.constant 0 : index
    %38 = vector.load %arg6[%37, %c0_12, %c0_13] : memref<8x8x128xf32, #tpu.memory_space<vmem>>, vector<1x8x128xf32>
    %39 = vector.shape_cast %38 : vector<1x8x128xf32> to vector<8x128xf32>
    %40 = vector.shape_cast %36 : vector<8x128xf32> to vector<1x8x128xf32>
    tpu.vector_store %arg6[%37, %c0_12, %c0_13], %40 {strides = array<i32>} : memref<8x8x128xf32, #tpu.memory_space<vmem>>, vector<1x8x128xf32>,
    %c1_i32 = arith.constant 1 : i32
    %41 = arith.index_cast %c1_i32 : i32 to index
    %c0_14 = arith.constant 0 : index
    %c0_15 = arith.constant 0 : index
    %42 = vector.load %arg2[%41, %c0_14, %c0_15] : memref<8x8x512xf32, #tpu.memory_space<vmem>>, vector<1x8x512xf32>
    %43 = vector.shape_cast %42 : vector<1x8x512xf32> to vector<8x512xf32>
    %44 = arith.truncf %36 : vector<8x128xf32> to vector<8x128xbf16>
    %c0_16 = arith.constant 0 : index
    %c0_17 = arith.constant 0 : index
    %45 = vector.load %arg3[%c0_16, %c0_17] : memref<128x512xbf16, #tpu.memory_space<vmem>>, vector<128x512xbf16>
    %cst_18 = arith.constant dense<0.000000e+00> : vector<8x512xf32>
    %46 = tpu.matmul %44, %45, %cst_18 {dimension_numbers = #tpu.dot_dimension_numbers<[1], [0], [0], [1], [0, 0, 1, 1], [], []>} : vector<8x128xbf16>, vector<128x512xbf16>, vector<8x512xf32> -> vector<8x512xf32>
    %47 = arith.addf %43, %46 : vector<8x512xf32>
    %48 = vector.extract_strided_slice %47 {offsets = [0, 0], sizes = [8, 128], strides = [1, 1]} : vector<8x512xf32> to vector<8x128xf32>
    %49 = arith.negf %48 : vector<8x128xf32>
    %50 = math.exp %49 : vector<8x128xf32>
    %cst_19 = arith.constant 1.000000e+00 : f32
    %51 = vector.broadcast %cst_19 : f32 to vector<8x128xf32>
    %52 = arith.addf %51, %50 : vector<8x128xf32>
    %53 = arith.divf %51, %52 : vector<8x128xf32>
    %54 = vector.extract_strided_slice %47 {offsets = [0, 128], sizes = [8, 128], strides = [1, 1]} : vector<8x512xf32> to vector<8x128xf32>
    %55 = arith.negf %54 : vector<8x128xf32>
    %56 = math.exp %55 : vector<8x128xf32>
    %cst_20 = arith.constant 1.000000e+00 : f32
    %57 = vector.broadcast %cst_20 : f32 to vector<8x128xf32>
    %58 = arith.addf %57, %56 : vector<8x128xf32>
    %59 = arith.divf %57, %58 : vector<8x128xf32>
    %60 = vector.extract_strided_slice %47 {offsets = [0, 256], sizes = [8, 128], strides = [1, 1]} : vector<8x512xf32> to vector<8x128xf32>
    %61 = math.tanh %60 : vector<8x128xf32>
    %62 = vector.extract_strided_slice %47 {offsets = [0, 384], sizes = [8, 128], strides = [1, 1]} : vector<8x512xf32> to vector<8x128xf32>
    %63 = arith.negf %62 : vector<8x128xf32>
    %64 = math.exp %63 : vector<8x128xf32>
    %cst_21 = arith.constant 1.000000e+00 : f32
    %65 = vector.broadcast %cst_21 : f32 to vector<8x128xf32>
    %66 = arith.addf %65, %64 : vector<8x128xf32>
    %67 = arith.divf %65, %66 : vector<8x128xf32>
    %68 = arith.mulf %59, %34 : vector<8x128xf32>
    %69 = arith.mulf %53, %61 : vector<8x128xf32>
    %70 = arith.addf %68, %69 : vector<8x128xf32>
    %71 = math.tanh %70 : vector<8x128xf32>
    %72 = arith.mulf %67, %71 : vector<8x128xf32>
    %73 = arith.index_cast %c1_i32 : i32 to index
    %c0_22 = arith.constant 0 : index
    %c0_23 = arith.constant 0 : index
    %74 = vector.load %arg6[%73, %c0_22, %c0_23] : memref<8x8x128xf32, #tpu.memory_space<vmem>>, vector<1x8x128xf32>
    %75 = vector.shape_cast %74 : vector<1x8x128xf32> to vector<8x128xf32>
    %76 = vector.shape_cast %72 : vector<8x128xf32> to vector<1x8x128xf32>
    tpu.vector_store %arg6[%73, %c0_22, %c0_23], %76 {strides = array<i32>} : memref<8x8x128xf32, #tpu.memory_space<vmem>>, vector<1x8x128xf32>,
    %c2_i32 = arith.constant 2 : i32
    %77 = arith.index_cast %c2_i32 : i32 to index
    %c0_24 = arith.constant 0 : index
    %c0_25 = arith.constant 0 : index
    %78 = vector.load %arg2[%77, %c0_24, %c0_25] : memref<8x8x512xf32, #tpu.memory_space<vmem>>, vector<1x8x512xf32>
    %79 = vector.shape_cast %78 : vector<1x8x512xf32> to vector<8x512xf32>
    %80 = arith.truncf %72 : vector<8x128xf32> to vector<8x128xbf16>
    %c0_26 = arith.constant 0 : index
    %c0_27 = arith.constant 0 : index
    %81 = vector.load %arg3[%c0_26, %c0_27] : memref<128x512xbf16, #tpu.memory_space<vmem>>, vector<128x512xbf16>
    %cst_28 = arith.constant dense<0.000000e+00> : vector<8x512xf32>
    %82 = tpu.matmul %80, %81, %cst_28 {dimension_numbers = #tpu.dot_dimension_numbers<[1], [0], [0], [1], [0, 0, 1, 1], [], []>} : vector<8x128xbf16>, vector<128x512xbf16>, vector<8x512xf32> -> vector<8x512xf32>
    %83 = arith.addf %79, %82 : vector<8x512xf32>
    %84 = vector.extract_strided_slice %83 {offsets = [0, 0], sizes = [8, 128], strides = [1, 1]} : vector<8x512xf32> to vector<8x128xf32>
    %85 = arith.negf %84 : vector<8x128xf32>
    %86 = math.exp %85 : vector<8x128xf32>
    %cst_29 = arith.constant 1.000000e+00 : f32
    %87 = vector.broadcast %cst_29 : f32 to vector<8x128xf32>
    %88 = arith.addf %87, %86 : vector<8x128xf32>
    %89 = arith.divf %87, %88 : vector<8x128xf32>
    %90 = vector.extract_strided_slice %83 {offsets = [0, 128], sizes = [8, 128], strides = [1, 1]} : vector<8x512xf32> to vector<8x128xf32>
    %91 = arith.negf %90 : vector<8x128xf32>
    %92 = math.exp %91 : vector<8x128xf32>
    %cst_30 = arith.constant 1.000000e+00 : f32
    %93 = vector.broadcast %cst_30 : f32 to vector<8x128xf32>
    %94 = arith.addf %93, %92 : vector<8x128xf32>
    %95 = arith.divf %93, %94 : vector<8x128xf32>
    %96 = vector.extract_strided_slice %83 {offsets = [0, 256], sizes = [8, 128], strides = [1, 1]} : vector<8x512xf32> to vector<8x128xf32>
    %97 = math.tanh %96 : vector<8x128xf32>
    %98 = vector.extract_strided_slice %83 {offsets = [0, 384], sizes = [8, 128], strides = [1, 1]} : vector<8x512xf32> to vector<8x128xf32>
    %99 = arith.negf %98 : vector<8x128xf32>
    %100 = math.exp %99 : vector<8x128xf32>
    %cst_31 = arith.constant 1.000000e+00 : f32
    %101 = vector.broadcast %cst_31 : f32 to vector<8x128xf32>
    %102 = arith.addf %101, %100 : vector<8x128xf32>
    %103 = arith.divf %101, %102 : vector<8x128xf32>
    %104 = arith.mulf %95, %70 : vector<8x128xf32>
    %105 = arith.mulf %89, %97 : vector<8x128xf32>
    %106 = arith.addf %104, %105 : vector<8x128xf32>
    %107 = math.tanh %106 : vector<8x128xf32>
    %108 = arith.mulf %103, %107 : vector<8x128xf32>
    %109 = arith.index_cast %c2_i32 : i32 to index
    %c0_32 = arith.constant 0 : index
    %c0_33 = arith.constant 0 : index
    %110 = vector.load %arg6[%109, %c0_32, %c0_33] : memref<8x8x128xf32, #tpu.memory_space<vmem>>, vector<1x8x128xf32>
    %111 = vector.shape_cast %110 : vector<1x8x128xf32> to vector<8x128xf32>
    %112 = vector.shape_cast %108 : vector<8x128xf32> to vector<1x8x128xf32>
    tpu.vector_store %arg6[%109, %c0_32, %c0_33], %112 {strides = array<i32>} : memref<8x8x128xf32, #tpu.memory_space<vmem>>, vector<1x8x128xf32>,
    %c3_i32 = arith.constant 3 : i32
    %113 = arith.index_cast %c3_i32 : i32 to index
    %c0_34 = arith.constant 0 : index
    %c0_35 = arith.constant 0 : index
    %114 = vector.load %arg2[%113, %c0_34, %c0_35] : memref<8x8x512xf32, #tpu.memory_space<vmem>>, vector<1x8x512xf32>
    %115 = vector.shape_cast %114 : vector<1x8x512xf32> to vector<8x512xf32>
    %116 = arith.truncf %108 : vector<8x128xf32> to vector<8x128xbf16>
    %c0_36 = arith.constant 0 : index
    %c0_37 = arith.constant 0 : index
    %117 = vector.load %arg3[%c0_36, %c0_37] : memref<128x512xbf16, #tpu.memory_space<vmem>>, vector<128x512xbf16>
    %cst_38 = arith.constant dense<0.000000e+00> : vector<8x512xf32>
    %118 = tpu.matmul %116, %117, %cst_38 {dimension_numbers = #tpu.dot_dimension_numbers<[1], [0], [0], [1], [0, 0, 1, 1], [], []>} : vector<8x128xbf16>, vector<128x512xbf16>, vector<8x512xf32> -> vector<8x512xf32>
    %119 = arith.addf %115, %118 : vector<8x512xf32>
    %120 = vector.extract_strided_slice %119 {offsets = [0, 0], sizes = [8, 128], strides = [1, 1]} : vector<8x512xf32> to vector<8x128xf32>
    %121 = arith.negf %120 : vector<8x128xf32>
    %122 = math.exp %121 : vector<8x128xf32>
    %cst_39 = arith.constant 1.000000e+00 : f32
    %123 = vector.broadcast %cst_39 : f32 to vector<8x128xf32>
    %124 = arith.addf %123, %122 : vector<8x128xf32>
    %125 = arith.divf %123, %124 : vector<8x128xf32>
    %126 = vector.extract_strided_slice %119 {offsets = [0, 128], sizes = [8, 128], strides = [1, 1]} : vector<8x512xf32> to vector<8x128xf32>
    %127 = arith.negf %126 : vector<8x128xf32>
    %128 = math.exp %127 : vector<8x128xf32>
    %cst_40 = arith.constant 1.000000e+00 : f32
    %129 = vector.broadcast %cst_40 : f32 to vector<8x128xf32>
    %130 = arith.addf %129, %128 : vector<8x128xf32>
    %131 = arith.divf %129, %130 : vector<8x128xf32>
    %132 = vector.extract_strided_slice %119 {offsets = [0, 256], sizes = [8, 128], strides = [1, 1]} : vector<8x512xf32> to vector<8x128xf32>
    %133 = math.tanh %132 : vector<8x128xf32>
    %134 = vector.extract_strided_slice %119 {offsets = [0, 384], sizes = [8, 128], strides = [1, 1]} : vector<8x512xf32> to vector<8x128xf32>
    %135 = arith.negf %134 : vector<8x128xf32>
    %136 = math.exp %135 : vector<8x128xf32>
    %cst_41 = arith.constant 1.000000e+00 : f32
    %137 = vector.broadcast %cst_41 : f32 to vector<8x128xf32>
    %138 = arith.addf %137, %136 : vector<8x128xf32>
    %139 = arith.divf %137, %138 : vector<8x128xf32>
    %140 = arith.mulf %131, %106 : vector<8x128xf32>
    %141 = arith.mulf %125, %133 : vector<8x128xf32>
    %142 = arith.addf %140, %141 : vector<8x128xf32>
    %143 = math.tanh %142 : vector<8x128xf32>
    %144 = arith.mulf %139, %143 : vector<8x128xf32>
    %145 = arith.index_cast %c3_i32 : i32 to index
    %c0_42 = arith.constant 0 : index
    %c0_43 = arith.constant 0 : index
    %146 = vector.load %arg6[%145, %c0_42, %c0_43] : memref<8x8x128xf32, #tpu.memory_space<vmem>>, vector<1x8x128xf32>
    %147 = vector.shape_cast %146 : vector<1x8x128xf32> to vector<8x128xf32>
    %148 = vector.shape_cast %144 : vector<8x128xf32> to vector<1x8x128xf32>
    tpu.vector_store %arg6[%145, %c0_42, %c0_43], %148 {strides = array<i32>} : memref<8x8x128xf32, #tpu.memory_space<vmem>>, vector<1x8x128xf32>,
    %c4_i32 = arith.constant 4 : i32
    %149 = arith.index_cast %c4_i32 : i32 to index
    %c0_44 = arith.constant 0 : index
    %c0_45 = arith.constant 0 : index
    %150 = vector.load %arg2[%149, %c0_44, %c0_45] : memref<8x8x512xf32, #tpu.memory_space<vmem>>, vector<1x8x512xf32>
    %151 = vector.shape_cast %150 : vector<1x8x512xf32> to vector<8x512xf32>
    %152 = arith.truncf %144 : vector<8x128xf32> to vector<8x128xbf16>
    %c0_46 = arith.constant 0 : index
    %c0_47 = arith.constant 0 : index
    %153 = vector.load %arg3[%c0_46, %c0_47] : memref<128x512xbf16, #tpu.memory_space<vmem>>, vector<128x512xbf16>
    %cst_48 = arith.constant dense<0.000000e+00> : vector<8x512xf32>
    %154 = tpu.matmul %152, %153, %cst_48 {dimension_numbers = #tpu.dot_dimension_numbers<[1], [0], [0], [1], [0, 0, 1, 1], [], []>} : vector<8x128xbf16>, vector<128x512xbf16>, vector<8x512xf32> -> vector<8x512xf32>
    %155 = arith.addf %151, %154 : vector<8x512xf32>
    %156 = vector.extract_strided_slice %155 {offsets = [0, 0], sizes = [8, 128], strides = [1, 1]} : vector<8x512xf32> to vector<8x128xf32>
    %157 = arith.negf %156 : vector<8x128xf32>
    %158 = math.exp %157 : vector<8x128xf32>
    %cst_49 = arith.constant 1.000000e+00 : f32
    %159 = vector.broadcast %cst_49 : f32 to vector<8x128xf32>
    %160 = arith.addf %159, %158 : vector<8x128xf32>
    %161 = arith.divf %159, %160 : vector<8x128xf32>
    %162 = vector.extract_strided_slice %155 {offsets = [0, 128], sizes = [8, 128], strides = [1, 1]} : vector<8x512xf32> to vector<8x128xf32>
    %163 = arith.negf %162 : vector<8x128xf32>
    %164 = math.exp %163 : vector<8x128xf32>
    %cst_50 = arith.constant 1.000000e+00 : f32
    %165 = vector.broadcast %cst_50 : f32 to vector<8x128xf32>
    %166 = arith.addf %165, %164 : vector<8x128xf32>
    %167 = arith.divf %165, %166 : vector<8x128xf32>
    %168 = vector.extract_strided_slice %155 {offsets = [0, 256], sizes = [8, 128], strides = [1, 1]} : vector<8x512xf32> to vector<8x128xf32>
    %169 = math.tanh %168 : vector<8x128xf32>
    %170 = vector.extract_strided_slice %155 {offsets = [0, 384], sizes = [8, 128], strides = [1, 1]} : vector<8x512xf32> to vector<8x128xf32>
    %171 = arith.negf %170 : vector<8x128xf32>
    %172 = math.exp %171 : vector<8x128xf32>
    %cst_51 = arith.constant 1.000000e+00 : f32
    %173 = vector.broadcast %cst_51 : f32 to vector<8x128xf32>
    %174 = arith.addf %173, %172 : vector<8x128xf32>
    %175 = arith.divf %173, %174 : vector<8x128xf32>
    %176 = arith.mulf %167, %142 : vector<8x128xf32>
    %177 = arith.mulf %161, %169 : vector<8x128xf32>
    %178 = arith.addf %176, %177 : vector<8x128xf32>
    %179 = math.tanh %178 : vector<8x128xf32>
    %180 = arith.mulf %175, %179 : vector<8x128xf32>
    %181 = arith.index_cast %c4_i32 : i32 to index
    %c0_52 = arith.constant 0 : index
    %c0_53 = arith.constant 0 : index
    %182 = vector.load %arg6[%181, %c0_52, %c0_53] : memref<8x8x128xf32, #tpu.memory_space<vmem>>, vector<1x8x128xf32>
    %183 = vector.shape_cast %182 : vector<1x8x128xf32> to vector<8x128xf32>
    %184 = vector.shape_cast %180 : vector<8x128xf32> to vector<1x8x128xf32>
    tpu.vector_store %arg6[%181, %c0_52, %c0_53], %184 {strides = array<i32>} : memref<8x8x128xf32, #tpu.memory_space<vmem>>, vector<1x8x128xf32>,
    %c5_i32 = arith.constant 5 : i32
    %185 = arith.index_cast %c5_i32 : i32 to index
    %c0_54 = arith.constant 0 : index
    %c0_55 = arith.constant 0 : index
    %186 = vector.load %arg2[%185, %c0_54, %c0_55] : memref<8x8x512xf32, #tpu.memory_space<vmem>>, vector<1x8x512xf32>
    %187 = vector.shape_cast %186 : vector<1x8x512xf32> to vector<8x512xf32>
    %188 = arith.truncf %180 : vector<8x128xf32> to vector<8x128xbf16>
    %c0_56 = arith.constant 0 : index
    %c0_57 = arith.constant 0 : index
    %189 = vector.load %arg3[%c0_56, %c0_57] : memref<128x512xbf16, #tpu.memory_space<vmem>>, vector<128x512xbf16>
    %cst_58 = arith.constant dense<0.000000e+00> : vector<8x512xf32>
    %190 = tpu.matmul %188, %189, %cst_58 {dimension_numbers = #tpu.dot_dimension_numbers<[1], [0], [0], [1], [0, 0, 1, 1], [], []>} : vector<8x128xbf16>, vector<128x512xbf16>, vector<8x512xf32> -> vector<8x512xf32>
    %191 = arith.addf %187, %190 : vector<8x512xf32>
    %192 = vector.extract_strided_slice %191 {offsets = [0, 0], sizes = [8, 128], strides = [1, 1]} : vector<8x512xf32> to vector<8x128xf32>
    %193 = arith.negf %192 : vector<8x128xf32>
    %194 = math.exp %193 : vector<8x128xf32>
    %cst_59 = arith.constant 1.000000e+00 : f32
    %195 = vector.broadcast %cst_59 : f32 to vector<8x128xf32>
    %196 = arith.addf %195, %194 : vector<8x128xf32>
    %197 = arith.divf %195, %196 : vector<8x128xf32>
    %198 = vector.extract_strided_slice %191 {offsets = [0, 128], sizes = [8, 128], strides = [1, 1]} : vector<8x512xf32> to vector<8x128xf32>
    %199 = arith.negf %198 : vector<8x128xf32>
    %200 = math.exp %199 : vector<8x128xf32>
    %cst_60 = arith.constant 1.000000e+00 : f32
    %201 = vector.broadcast %cst_60 : f32 to vector<8x128xf32>
    %202 = arith.addf %201, %200 : vector<8x128xf32>
    %203 = arith.divf %201, %202 : vector<8x128xf32>
    %204 = vector.extract_strided_slice %191 {offsets = [0, 256], sizes = [8, 128], strides = [1, 1]} : vector<8x512xf32> to vector<8x128xf32>
    %205 = math.tanh %204 : vector<8x128xf32>
    %206 = vector.extract_strided_slice %191 {offsets = [0, 384], sizes = [8, 128], strides = [1, 1]} : vector<8x512xf32> to vector<8x128xf32>
    %207 = arith.negf %206 : vector<8x128xf32>
    %208 = math.exp %207 : vector<8x128xf32>
    %cst_61 = arith.constant 1.000000e+00 : f32
    %209 = vector.broadcast %cst_61 : f32 to vector<8x128xf32>
    %210 = arith.addf %209, %208 : vector<8x128xf32>
    %211 = arith.divf %209, %210 : vector<8x128xf32>
    %212 = arith.mulf %203, %178 : vector<8x128xf32>
    %213 = arith.mulf %197, %205 : vector<8x128xf32>
    %214 = arith.addf %212, %213 : vector<8x128xf32>
    %215 = math.tanh %214 : vector<8x128xf32>
    %216 = arith.mulf %211, %215 : vector<8x128xf32>
    %217 = arith.index_cast %c5_i32 : i32 to index
    %c0_62 = arith.constant 0 : index
    %c0_63 = arith.constant 0 : index
    %218 = vector.load %arg6[%217, %c0_62, %c0_63] : memref<8x8x128xf32, #tpu.memory_space<vmem>>, vector<1x8x128xf32>
    %219 = vector.shape_cast %218 : vector<1x8x128xf32> to vector<8x128xf32>
    %220 = vector.shape_cast %216 : vector<8x128xf32> to vector<1x8x128xf32>
    tpu.vector_store %arg6[%217, %c0_62, %c0_63], %220 {strides = array<i32>} : memref<8x8x128xf32, #tpu.memory_space<vmem>>, vector<1x8x128xf32>,
    %c6_i32 = arith.constant 6 : i32
    %221 = arith.index_cast %c6_i32 : i32 to index
    %c0_64 = arith.constant 0 : index
    %c0_65 = arith.constant 0 : index
    %222 = vector.load %arg2[%221, %c0_64, %c0_65] : memref<8x8x512xf32, #tpu.memory_space<vmem>>, vector<1x8x512xf32>
    %223 = vector.shape_cast %222 : vector<1x8x512xf32> to vector<8x512xf32>
    %224 = arith.truncf %216 : vector<8x128xf32> to vector<8x128xbf16>
    %c0_66 = arith.constant 0 : index
    %c0_67 = arith.constant 0 : index
    %225 = vector.load %arg3[%c0_66, %c0_67] : memref<128x512xbf16, #tpu.memory_space<vmem>>, vector<128x512xbf16>
    %cst_68 = arith.constant dense<0.000000e+00> : vector<8x512xf32>
    %226 = tpu.matmul %224, %225, %cst_68 {dimension_numbers = #tpu.dot_dimension_numbers<[1], [0], [0], [1], [0, 0, 1, 1], [], []>} : vector<8x128xbf16>, vector<128x512xbf16>, vector<8x512xf32> -> vector<8x512xf32>
    %227 = arith.addf %223, %226 : vector<8x512xf32>
    %228 = vector.extract_strided_slice %227 {offsets = [0, 0], sizes = [8, 128], strides = [1, 1]} : vector<8x512xf32> to vector<8x128xf32>
    %229 = arith.negf %228 : vector<8x128xf32>
    %230 = math.exp %229 : vector<8x128xf32>
    %cst_69 = arith.constant 1.000000e+00 : f32
    %231 = vector.broadcast %cst_69 : f32 to vector<8x128xf32>
    %232 = arith.addf %231, %230 : vector<8x128xf32>
    %233 = arith.divf %231, %232 : vector<8x128xf32>
    %234 = vector.extract_strided_slice %227 {offsets = [0, 128], sizes = [8, 128], strides = [1, 1]} : vector<8x512xf32> to vector<8x128xf32>
    %235 = arith.negf %234 : vector<8x128xf32>
    %236 = math.exp %235 : vector<8x128xf32>
    %cst_70 = arith.constant 1.000000e+00 : f32
    %237 = vector.broadcast %cst_70 : f32 to vector<8x128xf32>
    %238 = arith.addf %237, %236 : vector<8x128xf32>
    %239 = arith.divf %237, %238 : vector<8x128xf32>
    %240 = vector.extract_strided_slice %227 {offsets = [0, 256], sizes = [8, 128], strides = [1, 1]} : vector<8x512xf32> to vector<8x128xf32>
    %241 = math.tanh %240 : vector<8x128xf32>
    %242 = vector.extract_strided_slice %227 {offsets = [0, 384], sizes = [8, 128], strides = [1, 1]} : vector<8x512xf32> to vector<8x128xf32>
    %243 = arith.negf %242 : vector<8x128xf32>
    %244 = math.exp %243 : vector<8x128xf32>
    %cst_71 = arith.constant 1.000000e+00 : f32
    %245 = vector.broadcast %cst_71 : f32 to vector<8x128xf32>
    %246 = arith.addf %245, %244 : vector<8x128xf32>
    %247 = arith.divf %245, %246 : vector<8x128xf32>
    %248 = arith.mulf %239, %214 : vector<8x128xf32>
    %249 = arith.mulf %233, %241 : vector<8x128xf32>
    %250 = arith.addf %248, %249 : vector<8x128xf32>
    %251 = math.tanh %250 : vector<8x128xf32>
    %252 = arith.mulf %247, %251 : vector<8x128xf32>
    %253 = arith.index_cast %c6_i32 : i32 to index
    %c0_72 = arith.constant 0 : index
    %c0_73 = arith.constant 0 : index
    %254 = vector.load %arg6[%253, %c0_72, %c0_73] : memref<8x8x128xf32, #tpu.memory_space<vmem>>, vector<1x8x128xf32>
    %255 = vector.shape_cast %254 : vector<1x8x128xf32> to vector<8x128xf32>
    %256 = vector.shape_cast %252 : vector<8x128xf32> to vector<1x8x128xf32>
    tpu.vector_store %arg6[%253, %c0_72, %c0_73], %256 {strides = array<i32>} : memref<8x8x128xf32, #tpu.memory_space<vmem>>, vector<1x8x128xf32>,
    %c7_i32 = arith.constant 7 : i32
    %257 = arith.index_cast %c7_i32 : i32 to index
    %c0_74 = arith.constant 0 : index
    %c0_75 = arith.constant 0 : index
    %258 = vector.load %arg2[%257, %c0_74, %c0_75] : memref<8x8x512xf32, #tpu.memory_space<vmem>>, vector<1x8x512xf32>
    %259 = vector.shape_cast %258 : vector<1x8x512xf32> to vector<8x512xf32>
    %260 = arith.truncf %252 : vector<8x128xf32> to vector<8x128xbf16>
    %c0_76 = arith.constant 0 : index
    %c0_77 = arith.constant 0 : index
    %261 = vector.load %arg3[%c0_76, %c0_77] : memref<128x512xbf16, #tpu.memory_space<vmem>>, vector<128x512xbf16>
    %cst_78 = arith.constant dense<0.000000e+00> : vector<8x512xf32>
    %262 = tpu.matmul %260, %261, %cst_78 {dimension_numbers = #tpu.dot_dimension_numbers<[1], [0], [0], [1], [0, 0, 1, 1], [], []>} : vector<8x128xbf16>, vector<128x512xbf16>, vector<8x512xf32> -> vector<8x512xf32>
    %263 = arith.addf %259, %262 : vector<8x512xf32>
    %264 = vector.extract_strided_slice %263 {offsets = [0, 0], sizes = [8, 128], strides = [1, 1]} : vector<8x512xf32> to vector<8x128xf32>
    %265 = arith.negf %264 : vector<8x128xf32>
    %266 = math.exp %265 : vector<8x128xf32>
    %cst_79 = arith.constant 1.000000e+00 : f32
    %267 = vector.broadcast %cst_79 : f32 to vector<8x128xf32>
    %268 = arith.addf %267, %266 : vector<8x128xf32>
    %269 = arith.divf %267, %268 : vector<8x128xf32>
    %270 = vector.extract_strided_slice %263 {offsets = [0, 128], sizes = [8, 128], strides = [1, 1]} : vector<8x512xf32> to vector<8x128xf32>
    %271 = arith.negf %270 : vector<8x128xf32>
    %272 = math.exp %271 : vector<8x128xf32>
    %cst_80 = arith.constant 1.000000e+00 : f32
    %273 = vector.broadcast %cst_80 : f32 to vector<8x128xf32>
    %274 = arith.addf %273, %272 : vector<8x128xf32>
    %275 = arith.divf %273, %274 : vector<8x128xf32>
    %276 = vector.extract_strided_slice %263 {offsets = [0, 256], sizes = [8, 128], strides = [1, 1]} : vector<8x512xf32> to vector<8x128xf32>
    %277 = math.tanh %276 : vector<8x128xf32>
    %278 = vector.extract_strided_slice %263 {offsets = [0, 384], sizes = [8, 128], strides = [1, 1]} : vector<8x512xf32> to vector<8x128xf32>
    %279 = arith.negf %278 : vector<8x128xf32>
    %280 = math.exp %279 : vector<8x128xf32>
    %cst_81 = arith.constant 1.000000e+00 : f32
    %281 = vector.broadcast %cst_81 : f32 to vector<8x128xf32>
    %282 = arith.addf %281, %280 : vector<8x128xf32>
    %283 = arith.divf %281, %282 : vector<8x128xf32>
    %284 = arith.mulf %275, %250 : vector<8x128xf32>
    %285 = arith.mulf %269, %277 : vector<8x128xf32>
    %286 = arith.addf %284, %285 : vector<8x128xf32>
    %287 = math.tanh %286 : vector<8x128xf32>
    %288 = arith.mulf %283, %287 : vector<8x128xf32>
    %289 = arith.index_cast %c7_i32 : i32 to index
    %c0_82 = arith.constant 0 : index
    %c0_83 = arith.constant 0 : index
    %290 = vector.load %arg6[%289, %c0_82, %c0_83] : memref<8x8x128xf32, #tpu.memory_space<vmem>>, vector<1x8x128xf32>
    %291 = vector.shape_cast %290 : vector<1x8x128xf32> to vector<8x128xf32>
    %292 = vector.shape_cast %288 : vector<8x128xf32> to vector<1x8x128xf32>
    tpu.vector_store %arg6[%289, %c0_82, %c0_83], %292 {strides = array<i32>} : memref<8x8x128xf32, #tpu.memory_space<vmem>>, vector<1x8x128xf32>,
    %c8_i32 = arith.constant 8 : i32
    %c0_84 = arith.constant 0 : index
    %c0_85 = arith.constant 0 : index
    %293 = vector.load %arg8[%c0_84, %c0_85] : memref<8x128xf32, #tpu.memory_space<vmem>>, vector<8x128xf32>
    tpu.vector_store %arg8[%c0_84, %c0_85], %288 {strides = array<i32>} : memref<8x128xf32, #tpu.memory_space<vmem>>, vector<8x128xf32>,
    %c0_86 = arith.constant 0 : index
    %c0_87 = arith.constant 0 : index
    %294 = vector.load %arg9[%c0_86, %c0_87] : memref<8x128xf32, #tpu.memory_space<vmem>>, vector<8x128xf32>
    tpu.vector_store %arg9[%c0_86, %c0_87], %286 {strides = array<i32>} : memref<8x128xf32, #tpu.memory_space<vmem>>, vector<8x128xf32>,
    %c0_i32_88 = arith.constant 0 : i32
    %295 = arith.cmpi eq, %arg1, %c0_i32_88 : i32
    %296 = arith.extui %295 : i1 to i32
    %c0_i32_89 = arith.constant 0 : i32
    %297 = arith.cmpi ne, %296, %c0_i32_89 : i32
    scf.if %297 {
      %c0_90 = arith.constant 0 : index
      %c0_91 = arith.constant 0 : index
      %298 = vector.load %arg7[%c0_90, %c0_91] : memref<8x128xf32, #tpu.memory_space<vmem>>, vector<8x128xf32>
      tpu.vector_store %arg7[%c0_90, %c0_91], %286 {strides = array<i32>} : memref<8x128xf32, #tpu.memory_space<vmem>>, vector<8x128xf32>,
    } else {
    }
    return
  }
  func.func @transform_0(%arg0: i32, %arg1: i32) -> (i32, i32, i32) {
    %c0_i32 = arith.constant 0 : i32
    %c0_i32_0 = arith.constant 0 : i32
    return %arg1, %arg0, %c0_i32 : i32, i32, i32
  }
  func.func @transform_1(%arg0: i32, %arg1: i32) -> (i32, i32) {
    %c0_i32 = arith.constant 0 : i32
    %c0_i32_0 = arith.constant 0 : i32
    %c0_i32_1 = arith.constant 0 : i32
    return %c0_i32, %c0_i32_0 : i32, i32
  }
  func.func @transform_2(%arg0: i32, %arg1: i32) -> (i32, i32) {
    %c0_i32 = arith.constant 0 : i32
    %c0_i32_0 = arith.constant 0 : i32
    return %arg0, %c0_i32 : i32, i32
  }
  func.func @transform_3(%arg0: i32, %arg1: i32) -> (i32, i32) {
    %c0_i32 = arith.constant 0 : i32
    %c0_i32_0 = arith.constant 0 : i32
    return %arg0, %c0_i32 : i32, i32
  }
  func.func @transform_4(%arg0: i32, %arg1: i32) -> (i32, i32, i32) {
    %c0_i32 = arith.constant 0 : i32
    %c0_i32_0 = arith.constant 0 : i32
    return %arg1, %arg0, %c0_i32 : i32, i32, i32
  }
  func.func @transform_5(%arg0: i32, %arg1: i32) -> (i32, i32) {
    %c0_i32 = arith.constant 0 : i32
    %c0_i32_0 = arith.constant 0 : i32
    return %arg0, %c0_i32 : i32, i32
  }
}

</mosaic_0001>

<bundles_post_ra>
// kernel: lstm_forward.1
= control target key start
LH: loop header
LB: loop body
LE: loop exit
PB: predicated region body
PF: predicated region fallthrough
CT: control target
= control target key end

     0   :  { %v3098_v2 = vmov 0   ;;  %s3884_s0 = inlined_call_operand.vmem [shape: f32[8,8,512], index: 0, kind: input, shape index: {}]   ;;  %s3885_s1 = inlined_call_operand.vmem [shape: bf16[128,512], index: 1, kind: input, shape index: {}]   ;;  %s3886_s2 = inlined_call_operand.vmem [shape: f32[8,128], index: 2, kind: input, shape index: {}]   ;;  %s3887_s3 = inlined_call_operand.vmem [shape: f32[8,128], index: 3, kind: input, shape index: {}]   ;;  %s3888_s4 = inlined_call_operand.vmem [shape: f32[8,8,128], index: 4, kind: output, shape index: {0}]   ;;  %s3889_s5 = inlined_call_operand.hbm [shape: f32[8,128], index: 5, kind: output, shape index: {1}]  }
   0x1   :  { %v3133_v0 = vld [vmem:[%s3885_s1 + $0x4] ss:$16 sps:$4 sm:$0xff]   ;;  %v3138_v1 = vld [vmem:[%s3885_s1] ss:$16 sps:$4 sm:$0xff]   ;;  %260 = vmatprep.mubr.bf16.mxu0 %v3098_v2  ;;  %301 = vmatprep.mubr.bf16.mxu1 %v3098_v2  ;;  %v3163_v6 = vld [vmem:[%s3885_s1 + $0xc] ss:$16 sps:$4 sm:$0xff]  }
   0x2   :  { %228 = vmatprep.subr.bf16.mxu0 %v3133_v0  ;;  %v3146_v3 = vld [vmem:[%s3885_s1 + $0x24] ss:$16 sps:$4 sm:$0xff]   ;;  %v3152_v4 = vld [vmem:[%s3885_s1 + $0x20] ss:$16 sps:$4 sm:$0xff]   ;;  %v3168_v7 = vld [vmem:[%s3885_s1 + $0x8] ss:$16 sps:$4 sm:$0xff]   ;;  %269 = vmatprep.subr.bf16.mxu1 %v3163_v6 }
   0x3   :  { %229 = vmatpush1.bf16.msra.mxu0 %v3138_v1  ;;  %v3158_v5 = vld [vmem:[%s3885_s1 + $0x44] ss:$16 sps:$4 sm:$0xff]   ;;  %v3174_v8 = vld [vmem:[%s3885_s1 + $0x40] ss:$16 sps:$4 sm:$0xff]   ;;  %270 = vmatpush1.bf16.msra.mxu1 %v3168_v7  ;;  %v3187_v10 = vld [vmem:[%s3885_s1 + $0x2c] ss:$16 sps:$4 sm:$0xff]  }
   0x4   :  { %230 = vmatprep.subr.bf16.mxu0 %v3146_v3  ;;  %v3181_v9 = vld [vmem:[%s3885_s1 + $0x64] ss:$16 sps:$4 sm:$0xff]   ;;  %v3192_v11 = vld [vmem:[%s3885_s1 + $0x28] ss:$16 sps:$4 sm:$0xff]   ;;  %271 = vmatprep.subr.bf16.mxu1 %v3187_v10  ;;  %v3199_v12 = vld [vmem:[%s3885_s1 + $0x60] ss:$16 sps:$4 sm:$0xff]  }
   0x5   :  { %v3204_v13 = vld [vmem:[%s3885_s1 + $0x84] ss:$16 sps:$4 sm:$0xff]   ;;  %v3209_v14 = vld [vmem:[%s3885_s1 + $0x4c] ss:$16 sps:$4 sm:$0xff]   ;;  %v3216_v15 = vld [vmem:[%s3885_s1 + $0x48] ss:$16 sps:$4 sm:$0xff]  }
   0x6   :  { %v3222_v16 = vld [vmem:[%s3885_s1 + $0x6c] ss:$16 sps:$4 sm:$0xff]   ;;  %v3228_v17 = vld [vmem:[%s3885_s1 + $0x80] ss:$16 sps:$4 sm:$0xff]   ;;  %v3234_v18 = vld [vmem:[%s3885_s1 + $0xa4] ss:$16 sps:$4 sm:$0xff]  }
   0x7   :  { %231 = vmatpush1.bf16.msra.mxu0 %v3152_v4  ;;  %272 = vmatpush1.bf16.msra.mxu1 %v3192_v11  ;;  %v3240_v19 = vld [vmem:[%s3885_s1 + $0x68] ss:$16 sps:$4 sm:$0xff]   ;;  %v3246_v20 = vld [vmem:[%s3885_s1 + $0x8c] ss:$16 sps:$4 sm:$0xff]   ;;  %v3251_v21 = vld [vmem:[%s3885_s1 + $0xa0] ss:$16 sps:$4 sm:$0xff]  }
   0x8   :  { %232 = vmatprep.subr.bf16.mxu0 %v3158_v5  ;;  %273 = vmatprep.subr.bf16.mxu1 %v3209_v14  ;;  %v3257_v22 = vld [vmem:[%s3885_s1 + $0xc4] ss:$16 sps:$4 sm:$0xff]   ;;  %v3264_v23 = vld [vmem:[%s3885_s1 + $0x88] ss:$16 sps:$4 sm:$0xff]   ;;  %v3269_v24 = vld [vmem:[%s3885_s1 + $0xc0] ss:$16 sps:$4 sm:$0xff]  }
   0x9   :  { %v3275_v25 = vld [vmem:[%s3885_s1 + $0xac] ss:$16 sps:$4 sm:$0xff]   ;;  %v3280_v26 = vld [vmem:[%s3885_s1 + $0xe4] ss:$16 sps:$4 sm:$0xff]   ;;  %v3285_v27 = vld [vmem:[%s3885_s1 + $0xa8] ss:$16 sps:$4 sm:$0xff]  }
   0xa   :  { %v3291_v28 = vld [vmem:[%s3885_s1 + $0xcc] ss:$16 sps:$4 sm:$0xff]   ;;  %v3298_v29 = vld [vmem:[%s3885_s1 + $0xe0] ss:$16 sps:$4 sm:$0xff]   ;;  %v3307_v31 = vld [vmem:[%s3885_s1 + $0xc8] ss:$16 sps:$4 sm:$0xff]  }
   0xb   :  { %233 = vmatpush1.bf16.msra.mxu0 %v3174_v8  ;;  %274 = vmatpush1.bf16.msra.mxu1 %v3216_v15  ;;  %v25_v30 = vld [vmem:[%s3886_s2] sm:$0xff]  ;;  %v3313_v32 = vld [vmem:[%s3885_s1 + $0xec] ss:$16 sps:$4 sm:$0xff]   ;;  %v3321_v34 = vld [vmem:[%s3885_s1 + $0xe8] ss:$16 sps:$4 sm:$0xff]  }
   0xc   :  { %234 = vmatprep.subr.bf16.mxu0 %v3181_v9  ;;  %275 = vmatprep.subr.bf16.mxu1 %v3222_v16  ;;  %v35_v33 = vpack.c.bf16 %v25_v30, %v25_v30 }
   0xf   :  { %235 = vmatpush1.bf16.msra.mxu0 %v3199_v12  ;;  %276 = vmatpush1.bf16.msra.mxu1 %v3240_v19 }
  0x10   :  { %236 = vmatprep.subr.bf16.mxu0 %v3204_v13  ;;  %277 = vmatprep.subr.bf16.mxu1 %v3246_v20 }
  0x13   :  { %237 = vmatpush1.bf16.msra.mxu0 %v3228_v17  ;;  %278 = vmatpush1.bf16.msra.mxu1 %v3264_v23 }
  0x14   :  { %238 = vmatprep.subr.bf16.mxu0 %v3234_v18  ;;  %279 = vmatprep.subr.bf16.mxu1 %v3275_v25 }
  0x17   :  { %239 = vmatpush1.bf16.msra.mxu0 %v3251_v21  ;;  %280 = vmatpush1.bf16.msra.mxu1 %v3285_v27 }
  0x18   :  { %240 = vmatprep.subr.bf16.mxu0 %v3257_v22  ;;  %281 = vmatprep.subr.bf16.mxu1 %v3291_v28 }
  0x1b   :  { %241 = vmatpush1.bf16.msra.mxu0 %v3269_v24  ;;  %282 = vmatpush1.bf16.msra.mxu1 %v3307_v31 }
  0x1c   :  { %242 = vmatprep.subr.bf16.mxu0 %v3280_v26 }
  0x1f   :  { %243 = vmatpush1.bf16.msra.mxu0 %v3298_v29 }
  0x20   :  { %537 = vmatprep.subr.bf16.mxu0 %v3133_v0 }
  0x21   :  { %11 = vsyncpa [#allocation5], 0  ;;  %283 = vmatprep.subr.bf16.mxu1 %v3313_v32  ;;  %v31_v35 = vld [vmem:[%s3884_s0] sm:$0xff]  ;;  %v32_v36 = vld [vmem:[%s3884_s0 + $0x8] sm:$0xff]  ;;  %s3099_s15 = smov [#allocation4]  }
  0x22   :  { %261 = vmatmul.mubr.bf16.vlgmr.msra.gmra.mrb[0].mxu0 %v35_v33  ;;  %284 = vmatpush1.bf16.msra.mxu1 %v3321_v34  ;;  %v34_v45 = vld [vmem:[%s3884_s0 + $0x18] sm:$0xff]  ;;  %v33_v51 = vld [vmem:[%s3884_s0 + $0x10] sm:$0xff]  ;;  %v27_v60 = vld [vmem:[%s3887_s3] sm:$0xff]  ;;  %s2523_s16 = sshll.u32 %s3099_s15, 4  ;;  %s2524_s16 = int_to_ptr.vmem [resolvable:$true] %s2523_s16 }
  0x23   :  { %538 = vmatpush1.bf16.msra.mxu0 %v3138_v1  ;;  %569 = vmatprep.mubr.bf16.mxu0 %v3098_v2  ;;  %p3079_p1 = scmp.lt.s32.totalorder %s2524_s16, %s2524_s16 }
  0x24   :  { %539 = vmatprep.subr.bf16.mxu0 %v3146_v3  ;;  %578 = vmatprep.subr.bf16.mxu1 %v3163_v6 }
  0x25   :  { %302 = vmatmul.mubr.bf16.vlgmr.msra.gmra.mrb[0].mxu1 %v35_v33 }
  0x26   :  { %579 = vmatpush1.bf16.msra.mxu1 %v3168_v7  ;;  %610 = vmatprep.mubr.bf16.mxu1 %v3098_v2 }
  0x27   :  { %540 = vmatpush1.bf16.msra.mxu0 %v3152_v4  ;;  %580 = vmatprep.subr.bf16.mxu1 %v3187_v10 }
  0x28   :  { %541 = vmatprep.subr.bf16.mxu0 %v3158_v5 }
  0x2a   :  { %581 = vmatpush1.bf16.msra.mxu1 %v3192_v11 }
  0x2b   :  { %542 = vmatpush1.bf16.msra.mxu0 %v3174_v8  ;;  %582 = vmatprep.subr.bf16.mxu1 %v3209_v14 }
  0x2c   :  { %543 = vmatprep.subr.bf16.mxu0 %v3181_v9 }
  0x2e   :  { %583 = vmatpush1.bf16.msra.mxu1 %v3216_v15 }
  0x2f   :  { %544 = vmatpush1.bf16.msra.mxu0 %v3199_v12  ;;  %584 = vmatprep.subr.bf16.mxu1 %v3222_v16 }
  0x30   :  { %545 = vmatprep.subr.bf16.mxu0 %v3204_v13 }
  0x32   :  { %585 = vmatpush1.bf16.msra.mxu1 %v3240_v19 }
  0x33   :  { %546 = vmatpush1.bf16.msra.mxu0 %v3228_v17  ;;  %586 = vmatprep.subr.bf16.mxu1 %v3246_v20 }
  0x34   :  { %547 = vmatprep.subr.bf16.mxu0 %v3234_v18 }
  0x36   :  { %587 = vmatpush1.bf16.msra.mxu1 %v3264_v23 }
  0x37   :  { %548 = vmatpush1.bf16.msra.mxu0 %v3251_v21  ;;  %588 = vmatprep.subr.bf16.mxu1 %v3275_v25 }
  0x38   :  { %549 = vmatprep.subr.bf16.mxu0 %v3257_v22 }
  0x3a   :  { %589 = vmatpush1.bf16.msra.mxu1 %v3285_v27 }
  0x3b   :  { %550 = vmatpush1.bf16.msra.mxu0 %v3269_v24  ;;  %590 = vmatprep.subr.bf16.mxu1 %v3291_v28 }
  0x3c   :  { %551 = vmatprep.subr.bf16.mxu0 %v3280_v26 }
  0x3e   :  { %591 = vmatpush1.bf16.msra.mxu1 %v3307_v31 }
  0x3f   :  { %552 = vmatpush1.bf16.msra.mxu0 %v3298_v29  ;;  %592 = vmatprep.subr.bf16.mxu1 %v3313_v32 }
  0x40   :  { %847 = vmatprep.subr.bf16.mxu0 %v3133_v0 }
  0x42   :  { %593 = vmatpush1.bf16.msra.mxu1 %v3321_v34 }
  0x43   :  { %888 = vmatprep.subr.bf16.mxu1 %v3163_v6 }
  0xf5   :  { %v262_v37 = vpop.f32.mrb[0].mxu0 }
  0xf6   :  { %v310_v38 = vadd.f32 %v262_v37, %v31_v35  ;;  %v264_v39 = vpop.f32.mrb[1].mxu0 }
  0xf7   :  { %v311_v40 = vadd.f32 %v264_v39, %v32_v36  ;;  %v266_v41 = vpop.f32.mrb[2].mxu0 }
  0xf8   :  { %v2565_v42 = vmul.f32 -1.442695, %v310_v38  ;;  %v267_v43 = vpop.f32.mrb[3].mxu0  ;;  %v303_v46 = vpop.f32.mrb[0].mxu1  ;;  %v2569_v41 = vld [vmem:[%s3884_s0 + $0x28] sm:$0xff] }
  0xf9   :  { %v2566_v44 = vmul.f32 -1.442695, %v311_v40  ;;  %v305_v47 = vpop.f32.mrb[1].mxu1  ;;  %v312_v53 = vadd.f32 %v303_v46, %v33_v51  ;;  %v2568_v40 = vld [vmem:[%s3884_s0 + $0x20] sm:$0xff] }
  0xfa   :  { %2946 = vpow2.f32 %v2565_v42  ;;  %v313_v48 = vadd.f32 %v305_v47, %v34_v45  ;;  %v307_v49 = vpop.f32.mrb[2].mxu1 }
  0xfb   :  { %2948 = vpow2.f32 %v2566_v44  ;;  %v308_v50 = vpop.f32.mrb[3].mxu1 }
  0xfc   :  { %v2567_v52 = vmul.f32 -1.442695, %v313_v48 }
  0xfe   :  { %2950 = vpow2.f32 %v2567_v52  ;;  %v2571_v52 = vld [vmem:[%s3884_s0 + $0x38] sm:$0xff] }
  0xff   :  { %2952 = vtanh.f32 %v312_v53 }
 0x104   :  { %v2947_v54 = vpop.eup %2946 }
 0x105   :  { %v2949_v55 = vpop.eup %2948  ;;  %v317_v56 = vadd.f32 1.0, %v2947_v54  ;;  %v2570_v54 = vld [vmem:[%s3884_s0 + $0x30] sm:$0xff] }
 0x106   :  { %v323_v57 = vadd.f32 1.0, %v2949_v55 }
 0x107   :  { %2954 = vrcp.f32 %v317_v56 }
 0x108   :  { %2956 = vrcp.f32 %v323_v57  ;;  %v2951_v58 = vpop.eup %2950 }
 0x109   :  { %v2953_v59 = vpop.eup %2952  ;;  %v330_v62 = vadd.f32 1.0, %v2951_v58 }
 0x10b   :  { %2958 = vrcp.f32 %v330_v62 }
 0x111   :  { %v2955_v61 = vpop.eup %2954 }
 0x112   :  { %v2957_v63 = vpop.eup %2956  ;;  %v334_v30 = vmul.f32 %v2955_v61, %v2953_v59 }
 0x113   :  { %v333_v33 = vmul.f32 %v2957_v63, %v27_v60 }
 0x115   :  { %v3378_v35 = vadd.f32 %v334_v30, %v333_v33  ;;  %v2959_v36 = vpop.eup %2958 }
 0x117   :  { %2960 = vtanh.f32 %v3378_v35 }
 0x121   :  { %v2961_v37 = vpop.eup %2960 }
 0x122   :  { %v337_v38 = vmul.f32 %v2961_v37, %v2959_v36 }
 0x124   :  { %338 = vst [vmem:[%s3888_s4] sm:$0xff] %v337_v38  ;;  %v344_v39 = vpack.c.bf16 %v337_v38, %v337_v38 }
 0x126   :  { %570 = vmatmul.mubr.bf16.vlgmr.msra.gmra.mrb[4].mxu0 %v344_v39  ;;  %611 = vmatmul.mubr.bf16.vlgmr.msra.gmra.mrb[4].mxu1 %v344_v39 }
 0x127   :  { %848 = vmatpush1.bf16.msra.mxu0 %v3138_v1  ;;  %889 = vmatpush1.bf16.msra.mxu1 %v3168_v7 }
 0x128   :  { %849 = vmatprep.subr.bf16.mxu0 %v3146_v3  ;;  %890 = vmatprep.subr.bf16.mxu1 %v3187_v10 }
 0x129   :  { %879 = vmatprep.mubr.bf16.mxu0 %v3098_v2  ;;  %920 = vmatprep.mubr.bf16.mxu1 %v3098_v2 }
 0x12b   :  { %850 = vmatpush1.bf16.msra.mxu0 %v3152_v4  ;;  %891 = vmatpush1.bf16.msra.mxu1 %v3192_v11 }
 0x12c   :  { %851 = vmatprep.subr.bf16.mxu0 %v3158_v5  ;;  %892 = vmatprep.subr.bf16.mxu1 %v3209_v14 }
 0x12f   :  { %852 = vmatpush1.bf16.msra.mxu0 %v3174_v8  ;;  %893 = vmatpush1.bf16.msra.mxu1 %v3216_v15 }
 0x130   :  { %853 = vmatprep.subr.bf16.mxu0 %v3181_v9  ;;  %894 = vmatprep.subr.bf16.mxu1 %v3222_v16 }
 0x133   :  { %854 = vmatpush1.bf16.msra.mxu0 %v3199_v12  ;;  %895 = vmatpush1.bf16.msra.mxu1 %v3240_v19 }
 0x134   :  { %855 = vmatprep.subr.bf16.mxu0 %v3204_v13  ;;  %896 = vmatprep.subr.bf16.mxu1 %v3246_v20 }
 0x137   :  { %856 = vmatpush1.bf16.msra.mxu0 %v3228_v17  ;;  %897 = vmatpush1.bf16.msra.mxu1 %v3264_v23 }
 0x138   :  { %857 = vmatprep.subr.bf16.mxu0 %v3234_v18  ;;  %898 = vmatprep.subr.bf16.mxu1 %v3275_v25 }
 0x13b   :  { %858 = vmatpush1.bf16.msra.mxu0 %v3251_v21  ;;  %899 = vmatpush1.bf16.msra.mxu1 %v3285_v27 }
 0x13c   :  { %859 = vmatprep.subr.bf16.mxu0 %v3257_v22  ;;  %900 = vmatprep.subr.bf16.mxu1 %v3291_v28 }
 0x13f   :  { %860 = vmatpush1.bf16.msra.mxu0 %v3269_v24  ;;  %901 = vmatpush1.bf16.msra.mxu1 %v3307_v31 }
 0x140   :  { %861 = vmatprep.subr.bf16.mxu0 %v3280_v26  ;;  %902 = vmatprep.subr.bf16.mxu1 %v3313_v32 }
 0x143   :  { %862 = vmatpush1.bf16.msra.mxu0 %v3298_v29  ;;  %903 = vmatpush1.bf16.msra.mxu1 %v3321_v34 }
 0x144   :  { %1157 = vmatprep.subr.bf16.mxu0 %v3133_v0  ;;  %1198 = vmatprep.subr.bf16.mxu1 %v3163_v6 }
 0x1f9   :  { %v571_v42 = vpop.f32.mrb[4].mxu0  ;;  %v612_v43 = vpop.f32.mrb[4].mxu1 }
 0x1fa   :  { %v619_v44 = vadd.f32 %v2568_v40, %v571_v42  ;;  %v573_v45 = vpop.f32.mrb[5].mxu0  ;;  %v614_v46 = vpop.f32.mrb[5].mxu1  ;;  %v621_v56 = vadd.f32 %v2570_v54, %v612_v43  ;;  %v3546_v54 = vld [vmem:[%s3885_s1 + $0x4c] ss:$16 sps:$4 sm:$0xff]  }
 0x1fb   :  { %v620_v47 = vadd.f32 %v2569_v41, %v573_v45  ;;  %v575_v48 = vpop.f32.mrb[6].mxu0  ;;  %v616_v49 = vpop.f32.mrb[6].mxu1  ;;  %v622_v53 = vadd.f32 %v2571_v52, %v614_v46  ;;  %v3532_v52 = vld [vmem:[%s3885_s1 + $0x28] ss:$16 sps:$4 sm:$0xff]  }
 0x1fc   :  { %v2604_v50 = vmul.f32 -1.442695, %v619_v44  ;;  %v576_v0 = vpop.f32.mrb[7].mxu0  ;;  %v617_v51 = vpop.f32.mrb[7].mxu1  ;;  %v3498_v48 = vld [vmem:[%s3885_s1 + $0xc] ss:$16 sps:$4 sm:$0xff]  }
 0x1fd   :  { %v2605_v6 = vmul.f32 -1.442695, %v620_v47  ;;  %v2606_v55 = vmul.f32 -1.442695, %v622_v53  ;;  %v3493_v47 = vld [vmem:[%s3885_s1 + $0x4] ss:$16 sps:$4 sm:$0xff]  }
 0x1fe   :  { %2962 = vpow2.f32 %v2604_v50  ;;  %v3503_v49 = vld [vmem:[%s3885_s1] ss:$16 sps:$4 sm:$0xff]   ;;  %v3508_v50 = vld [vmem:[%s3885_s1 + $0x8] ss:$16 sps:$4 sm:$0xff]   ;;  %v3517_v0 = vld [vmem:[%s3885_s1 + $0x24] ss:$16 sps:$4 sm:$0xff]  }
 0x1ff   :  { %2964 = vpow2.f32 %v2605_v6  ;;  %v3522_v51 = vld [vmem:[%s3885_s1 + $0x2c] ss:$16 sps:$4 sm:$0xff]   ;;  %v3527_v6 = vld [vmem:[%s3885_s1 + $0x20] ss:$16 sps:$4 sm:$0xff]   ;;  %v3541_v53 = vld [vmem:[%s3885_s1 + $0x44] ss:$16 sps:$4 sm:$0xff]  }
 0x200   :  { %2966 = vpow2.f32 %v2606_v55  ;;  %v3551_v55 = vld [vmem:[%s3885_s1 + $0x40] ss:$16 sps:$4 sm:$0xff]  }
 0x201   :  { %2968 = vtanh.f32 %v621_v56  ;;  %v3556_v56 = vld [vmem:[%s3885_s1 + $0x48] ss:$16 sps:$4 sm:$0xff]  }
 0x208   :  { %v2963_v57 = vpop.eup %2962 }
 0x209   :  { %v2965_v58 = vpop.eup %2964  ;;  %v626_v59 = vadd.f32 1.0, %v2963_v57  ;;  %v3565_v57 = vld [vmem:[%s3885_s1 + $0x64] ss:$16 sps:$4 sm:$0xff]  }
 0x20a   :  { %v632_v60 = vadd.f32 1.0, %v2965_v58  ;;  %v2967_v61 = vpop.eup %2966  ;;  %v3570_v58 = vld [vmem:[%s3885_s1 + $0x6c] ss:$16 sps:$4 sm:$0xff]  }
 0x20b   :  { %2970 = vrcp.f32 %v626_v59  ;;  %v2969_v62 = vpop.eup %2968  ;;  %v639_v36 = vadd.f32 1.0, %v2967_v61  ;;  %v3575_v59 = vld [vmem:[%s3885_s1 + $0x60] ss:$16 sps:$4 sm:$0xff]   ;;  %v3589_v61 = vld [vmem:[%s3885_s1 + $0x84] ss:$16 sps:$4 sm:$0xff]  }
 0x20c   :  { %2972 = vrcp.f32 %v632_v60  ;;  %v3580_v60 = vld [vmem:[%s3885_s1 + $0x68] ss:$16 sps:$4 sm:$0xff]  }
 0x20d   :  { %2974 = vrcp.f32 %v639_v36  ;;  %v3618_v36 = vld [vmem:[%s3885_s1 + $0xa0] ss:$16 sps:$4 sm:$0xff]  }
 0x215   :  { %v2971_v63 = vpop.eup %2970 }
 0x216   :  { %v2973_v30 = vpop.eup %2972  ;;  %v643_v33 = vmul.f32 %v2971_v63, %v2969_v62  ;;  %v3594_v62 = vld [vmem:[%s3885_s1 + $0x8c] ss:$16 sps:$4 sm:$0xff]   ;;  %v3599_v63 = vld [vmem:[%s3885_s1 + $0x80] ss:$16 sps:$4 sm:$0xff]  }
 0x217   :  { %v642_v37 = vmul.f32 %v2973_v30, %v3378_v35  ;;  %v2975_v39 = vpop.eup %2974  ;;  %v3604_v30 = vld [vmem:[%s3885_s1 + $0x88] ss:$16 sps:$4 sm:$0xff]  }
 0x219   :  { %v3431_v38 = vadd.f32 %v643_v33, %v642_v37  ;;  %v3611_v33 = vld [vmem:[%s3885_s1 + $0xa4] ss:$16 sps:$4 sm:$0xff]   ;;  %v3623_v37 = vld [vmem:[%s3885_s1 + $0xa8] ss:$16 sps:$4 sm:$0xff]  }
 0x21b   :  { %2976 = vtanh.f32 %v3431_v38 }
 0x225   :  { %v2977_v40 = vpop.eup %2976 }
 0x226   :  { %v646_v41 = vmul.f32 %v2977_v40, %v2975_v39  ;;  %v3634_v39 = vld [vmem:[%s3885_s1 + $0xc4] ss:$16 sps:$4 sm:$0xff]   ;;  %v3639_v40 = vld [vmem:[%s3885_s1 + $0xcc] ss:$16 sps:$4 sm:$0xff]  }
 0x228   :  { %2607 = vst [vmem:[%s3888_s4 + $0x8] sm:$0xff] %v646_v41  ;;  %v654_v42 = vpack.c.bf16 %v646_v41, %v646_v41  ;;  %v3647_v41 = vld [vmem:[%s3885_s1 + $0xc0] ss:$16 sps:$4 sm:$0xff]  }
 0x22a   :  { %880 = vmatmul.mubr.bf16.vlgmr.msra.gmra.mrb[8].mxu0 %v654_v42  ;;  %921 = vmatmul.mubr.bf16.vlgmr.msra.gmra.mrb[8].mxu1 %v654_v42  ;;  %v3652_v42 = vld [vmem:[%s3885_s1 + $0xc8] ss:$16 sps:$4 sm:$0xff]  }
 0x22b   :  { %1158 = vmatpush1.bf16.msra.mxu0 %v3138_v1  ;;  %1199 = vmatpush1.bf16.msra.mxu1 %v3168_v7  ;;  %v2608_v1 = vld [vmem:[%s3884_s0 + $0x40] sm:$0xff] }
 0x22c   :  { %1159 = vmatprep.subr.bf16.mxu0 %v3146_v3  ;;  %1200 = vmatprep.subr.bf16.mxu1 %v3187_v10  ;;  %v2609_v3 = vld [vmem:[%s3884_s0 + $0x48] sm:$0xff] }
 0x22d   :  { %1189 = vmatprep.mubr.bf16.mxu0 %v3098_v2  ;;  %1230 = vmatprep.mubr.bf16.mxu1 %v3098_v2 }
 0x22f   :  { %1160 = vmatpush1.bf16.msra.mxu0 %v3152_v4  ;;  %1201 = vmatpush1.bf16.msra.mxu1 %v3192_v11 }
 0x230   :  { %1161 = vmatprep.subr.bf16.mxu0 %v3158_v5  ;;  %1202 = vmatprep.subr.bf16.mxu1 %v3209_v14 }
 0x233   :  { %1162 = vmatpush1.bf16.msra.mxu0 %v3174_v8  ;;  %1203 = vmatpush1.bf16.msra.mxu1 %v3216_v15 }
 0x234   :  { %1163 = vmatprep.subr.bf16.mxu0 %v3181_v9  ;;  %1204 = vmatprep.subr.bf16.mxu1 %v3222_v16 }
 0x237   :  { %1164 = vmatpush1.bf16.msra.mxu0 %v3199_v12  ;;  %1205 = vmatpush1.bf16.msra.mxu1 %v3240_v19  ;;  %v2610_v19 = vld [vmem:[%s3884_s0 + $0x50] sm:$0xff] }
 0x238   :  { %1165 = vmatprep.subr.bf16.mxu0 %v3204_v13  ;;  %1206 = vmatprep.subr.bf16.mxu1 %v3246_v20 }
 0x23b   :  { %1166 = vmatpush1.bf16.msra.mxu0 %v3228_v17  ;;  %1207 = vmatpush1.bf16.msra.mxu1 %v3264_v23  ;;  %v2611_v17 = vld [vmem:[%s3884_s0 + $0x58] sm:$0xff] }
 0x23c   :  { %1167 = vmatprep.subr.bf16.mxu0 %v3234_v18  ;;  %1208 = vmatprep.subr.bf16.mxu1 %v3275_v25 }
 0x23f   :  { %1168 = vmatpush1.bf16.msra.mxu0 %v3251_v21  ;;  %1209 = vmatpush1.bf16.msra.mxu1 %v3285_v27 }
 0x240   :  { %1169 = vmatprep.subr.bf16.mxu0 %v3257_v22  ;;  %1210 = vmatprep.subr.bf16.mxu1 %v3291_v28 }
 0x243   :  { %1170 = vmatpush1.bf16.msra.mxu0 %v3269_v24  ;;  %1211 = vmatpush1.bf16.msra.mxu1 %v3307_v31 }
 0x244   :  { %1171 = vmatprep.subr.bf16.mxu0 %v3280_v26  ;;  %1212 = vmatprep.subr.bf16.mxu1 %v3313_v32 }
 0x247   :  { %1172 = vmatpush1.bf16.msra.mxu0 %v3298_v29  ;;  %1213 = vmatpush1.bf16.msra.mxu1 %v3321_v34 }
 0x248   :  { %1467 = vmatprep.subr.bf16.mxu0 %v3493_v47  ;;  %1508 = vmatprep.subr.bf16.mxu1 %v3498_v48 }
 0x2fd   :  { %v881_v4 = vpop.f32.mrb[8].mxu0  ;;  %v922_v5 = vpop.f32.mrb[8].mxu1 }
 0x2fe   :  { %v929_v7 = vadd.f32 %v2608_v1, %v881_v4  ;;  %v883_v8 = vpop.f32.mrb[9].mxu0  ;;  %v924_v9 = vpop.f32.mrb[9].mxu1  ;;  %v931_v21 = vadd.f32 %v2610_v19, %v922_v5  ;;  %v3659_v1 = vld [vmem:[%s3885_s1 + $0xe4] ss:$16 sps:$4 sm:$0xff]   ;;  %v3671_v4 = vld [vmem:[%s3885_s1 + $0xe0] ss:$16 sps:$4 sm:$0xff]  }
 0x2ff   :  { %v930_v10 = vadd.f32 %v2609_v3, %v883_v8  ;;  %v885_v11 = vpop.f32.mrb[10].mxu0  ;;  %v926_v12 = vpop.f32.mrb[10].mxu1  ;;  %v932_v18 = vadd.f32 %v2611_v17, %v924_v9  ;;  %v3664_v3 = vld [vmem:[%s3885_s1 + $0xec] ss:$16 sps:$4 sm:$0xff]   ;;  %v3676_v5 = vld [vmem:[%s3885_s1 + $0xe8] ss:$16 sps:$4 sm:$0xff]  }
 0x300   :  { %v2644_v13 = vmul.f32 -1.442695, %v929_v7  ;;  %v886_v14 = vpop.f32.mrb[11].mxu0  ;;  %v927_v15 = vpop.f32.mrb[11].mxu1  ;;  %v2648_v7 = vld [vmem:[%s3884_s0 + $0x60] sm:$0xff]  ;;  %v2649_v8 = vld [vmem:[%s3884_s0 + $0x68] sm:$0xff] }
 0x301   :  { %v2645_v16 = vmul.f32 -1.442695, %v930_v10  ;;  %v2646_v20 = vmul.f32 -1.442695, %v932_v18 }
 0x302   :  { %2978 = vpow2.f32 %v2644_v13 }
 0x303   :  { %2980 = vpow2.f32 %v2645_v16 }
 0x304   :  { %2982 = vpow2.f32 %v2646_v20 }
 0x305   :  { %2984 = vtanh.f32 %v931_v21  ;;  %v2651_v21 = vld [vmem:[%s3884_s0 + $0x78] sm:$0xff] }
 0x30c   :  { %v2979_v22 = vpop.eup %2978 }
 0x30d   :  { %v2981_v23 = vpop.eup %2980  ;;  %v936_v24 = vadd.f32 1.0, %v2979_v22 }
 0x30e   :  { %v942_v25 = vadd.f32 1.0, %v2981_v23  ;;  %v2983_v26 = vpop.eup %2982  ;;  %v2650_v23 = vld [vmem:[%s3884_s0 + $0x70] sm:$0xff] }
 0x30f   :  { %2986 = vrcp.f32 %v936_v24  ;;  %v2985_v27 = vpop.eup %2984  ;;  %v949_v32 = vadd.f32 1.0, %v2983_v26 }
 0x310   :  { %2988 = vrcp.f32 %v942_v25 }
 0x311   :  { %2990 = vrcp.f32 %v949_v32 }
 0x319   :  { %v2987_v28 = vpop.eup %2986 }
 0x31a   :  { %v2989_v29 = vpop.eup %2988  ;;  %v953_v31 = vmul.f32 %v2987_v28, %v2985_v27 }
 0x31b   :  { %v952_v34 = vmul.f32 %v2989_v29, %v3431_v38  ;;  %v2991_v43 = vpop.eup %2990  ;;  %v3628_v38 = vld [vmem:[%s3885_s1 + $0xac] ss:$16 sps:$4 sm:$0xff]  }
 0x31d   :  { %v3482_v35 = vadd.f32 %v953_v31, %v952_v34 }
 0x31f   :  { %2992 = vtanh.f32 %v3482_v35 }
 0x329   :  { %v2993_v44 = vpop.eup %2992 }
 0x32a   :  { %v956_v45 = vmul.f32 %v2993_v44, %v2991_v43 }
 0x32c   :  { %2647 = vst [vmem:[%s3888_s4 + $0x10] sm:$0xff] %v956_v45  ;;  %v964_v46 = vpack.c.bf16 %v956_v45, %v956_v45 }
 0x32e   :  { %1190 = vmatmul.mubr.bf16.vlgmr.msra.gmra.mrb[12].mxu0 %v964_v46  ;;  %1231 = vmatmul.mubr.bf16.vlgmr.msra.gmra.mrb[12].mxu1 %v964_v46 }
 0x32f   :  { %1499 = vmatprep.mubr.bf16.mxu0 %v3098_v2  ;;  %1540 = vmatprep.mubr.bf16.mxu1 %v3098_v2 }
 0x330   :  { %1468 = vmatpush1.bf16.msra.mxu0 %v3503_v49  ;;  %1509 = vmatpush1.bf16.msra.mxu1 %v3508_v50 }
 0x331   :  { %1469 = vmatprep.subr.bf16.mxu0 %v3517_v0  ;;  %1510 = vmatprep.subr.bf16.mxu1 %v3522_v51 }
 0x334   :  { %1470 = vmatpush1.bf16.msra.mxu0 %v3527_v6  ;;  %1511 = vmatpush1.bf16.msra.mxu1 %v3532_v52 }
 0x335   :  { %1471 = vmatprep.subr.bf16.mxu0 %v3541_v53  ;;  %1512 = vmatprep.subr.bf16.mxu1 %v3546_v54 }
 0x338   :  { %1472 = vmatpush1.bf16.msra.mxu0 %v3551_v55  ;;  %1513 = vmatpush1.bf16.msra.mxu1 %v3556_v56 }
 0x339   :  { %1473 = vmatprep.subr.bf16.mxu0 %v3565_v57  ;;  %1514 = vmatprep.subr.bf16.mxu1 %v3570_v58 }
 0x33c   :  { %1474 = vmatpush1.bf16.msra.mxu0 %v3575_v59  ;;  %1515 = vmatpush1.bf16.msra.mxu1 %v3580_v60 }
 0x33d   :  { %1475 = vmatprep.subr.bf16.mxu0 %v3589_v61  ;;  %1516 = vmatprep.subr.bf16.mxu1 %v3594_v62 }
 0x340   :  { %1476 = vmatpush1.bf16.msra.mxu0 %v3599_v63  ;;  %1517 = vmatpush1.bf16.msra.mxu1 %v3604_v30 }
 0x341   :  { %1477 = vmatprep.subr.bf16.mxu0 %v3611_v33  ;;  %1518 = vmatprep.subr.bf16.mxu1 %v3628_v38 }
 0x344   :  { %1478 = vmatpush1.bf16.msra.mxu0 %v3618_v36  ;;  %1519 = vmatpush1.bf16.msra.mxu1 %v3623_v37 }
 0x345   :  { %1479 = vmatprep.subr.bf16.mxu0 %v3634_v39  ;;  %1520 = vmatprep.subr.bf16.mxu1 %v3639_v40 }
 0x348   :  { %1480 = vmatpush1.bf16.msra.mxu0 %v3647_v41  ;;  %1521 = vmatpush1.bf16.msra.mxu1 %v3652_v42 }
 0x349   :  { %1481 = vmatprep.subr.bf16.mxu0 %v3659_v1  ;;  %1522 = vmatprep.subr.bf16.mxu1 %v3664_v3 }
 0x34c   :  { %1482 = vmatpush1.bf16.msra.mxu0 %v3671_v4  ;;  %1523 = vmatpush1.bf16.msra.mxu1 %v3676_v5 }
 0x34d   :  { %1777 = vmatprep.subr.bf16.mxu0 %v3493_v47  ;;  %1818 = vmatprep.subr.bf16.mxu1 %v3498_v48 }
 0x401   :  { %v1191_v9 = vpop.f32.mrb[12].mxu0  ;;  %v1232_v10 = vpop.f32.mrb[12].mxu1 }
 0x402   :  { %v1239_v11 = vadd.f32 %v2648_v7, %v1191_v9  ;;  %v1193_v12 = vpop.f32.mrb[13].mxu0  ;;  %v1234_v13 = vpop.f32.mrb[13].mxu1  ;;  %v1241_v25 = vadd.f32 %v2650_v23, %v1232_v10 }
 0x403   :  { %v1240_v14 = vadd.f32 %v2649_v8, %v1193_v12  ;;  %v1195_v15 = vpop.f32.mrb[14].mxu0  ;;  %v1236_v16 = vpop.f32.mrb[14].mxu1  ;;  %v1242_v22 = vadd.f32 %v2651_v21, %v1234_v13  ;;  %v2689_v12 = vld [vmem:[%s3884_s0 + $0x88] sm:$0xff] }
 0x404   :  { %v2684_v17 = vmul.f32 -1.442695, %v1239_v11  ;;  %v1196_v18 = vpop.f32.mrb[15].mxu0  ;;  %v1237_v19 = vpop.f32.mrb[15].mxu1 }
 0x405   :  { %v2685_v20 = vmul.f32 -1.442695, %v1240_v14  ;;  %v2686_v24 = vmul.f32 -1.442695, %v1242_v22 }
 0x406   :  { %2994 = vpow2.f32 %v2684_v17 }
 0x407   :  { %2996 = vpow2.f32 %v2685_v20 }
 0x408   :  { %2998 = vpow2.f32 %v2686_v24 }
 0x409   :  { %3000 = vtanh.f32 %v1241_v25  ;;  %v2691_v25 = vld [vmem:[%s3884_s0 + $0x98] sm:$0xff] }
 0x410   :  { %v2995_v26 = vpop.eup %2994 }
 0x411   :  { %v2997_v27 = vpop.eup %2996  ;;  %v1246_v28 = vadd.f32 1.0, %v2995_v26 }
 0x412   :  { %v1252_v29 = vadd.f32 1.0, %v2997_v27  ;;  %v2999_v31 = vpop.eup %2998  ;;  %v2690_v27 = vld [vmem:[%s3884_s0 + $0x90] sm:$0xff] }
 0x413   :  { %3002 = vrcp.f32 %v1246_v28  ;;  %v3001_v32 = vpop.eup %3000  ;;  %v1259_v45 = vadd.f32 1.0, %v2999_v31 }
 0x414   :  { %3004 = vrcp.f32 %v1252_v29 }
 0x415   :  { %3006 = vrcp.f32 %v1259_v45 }
 0x41d   :  { %v3003_v34 = vpop.eup %3002 }
 0x41e   :  { %v3005_v43 = vpop.eup %3004  ;;  %v1263_v44 = vmul.f32 %v3003_v34, %v3001_v32 }
 0x41f   :  { %v1262_v46 = vmul.f32 %v3005_v43, %v3482_v35  ;;  %v3007_v8 = vpop.eup %3006  ;;  %v2688_v35 = vld [vmem:[%s3884_s0 + $0x80] sm:$0xff] }
 0x421   :  { %v3697_v7 = vadd.f32 %v1263_v44, %v1262_v46 }
 0x423   :  { %3008 = vtanh.f32 %v3697_v7 }
 0x42d   :  { %v3009_v9 = vpop.eup %3008 }
 0x42e   :  { %v1266_v10 = vmul.f32 %v3009_v9, %v3007_v8 }
 0x430   :  { %2687 = vst [vmem:[%s3888_s4 + $0x18] sm:$0xff] %v1266_v10  ;;  %v1274_v11 = vpack.c.bf16 %v1266_v10, %v1266_v10 }
 0x432   :  { %1500 = vmatmul.mubr.bf16.vlgmr.msra.gmra.mrb[16].mxu0 %v1274_v11  ;;  %1541 = vmatmul.mubr.bf16.vlgmr.msra.gmra.mrb[16].mxu1 %v1274_v11 }
 0x433   :  { %1778 = vmatpush1.bf16.msra.mxu0 %v3503_v49  ;;  %1819 = vmatpush1.bf16.msra.mxu1 %v3508_v50 }
 0x434   :  { %1779 = vmatprep.subr.bf16.mxu0 %v3517_v0  ;;  %1820 = vmatprep.subr.bf16.mxu1 %v3522_v51 }
 0x435   :  { %1809 = vmatprep.mubr.bf16.mxu0 %v3098_v2  ;;  %1850 = vmatprep.mubr.bf16.mxu1 %v3098_v2 }
 0x437   :  { %1780 = vmatpush1.bf16.msra.mxu0 %v3527_v6  ;;  %1821 = vmatpush1.bf16.msra.mxu1 %v3532_v52 }
 0x438   :  { %1781 = vmatprep.subr.bf16.mxu0 %v3541_v53  ;;  %1822 = vmatprep.subr.bf16.mxu1 %v3546_v54 }
 0x43b   :  { %1782 = vmatpush1.bf16.msra.mxu0 %v3551_v55  ;;  %1823 = vmatpush1.bf16.msra.mxu1 %v3556_v56 }
 0x43c   :  { %1783 = vmatprep.subr.bf16.mxu0 %v3565_v57  ;;  %1824 = vmatprep.subr.bf16.mxu1 %v3570_v58 }
 0x43f   :  { %1784 = vmatpush1.bf16.msra.mxu0 %v3575_v59  ;;  %1825 = vmatpush1.bf16.msra.mxu1 %v3580_v60 }
 0x440   :  { %1785 = vmatprep.subr.bf16.mxu0 %v3589_v61  ;;  %1826 = vmatprep.subr.bf16.mxu1 %v3594_v62 }
 0x443   :  { %1786 = vmatpush1.bf16.msra.mxu0 %v3599_v63  ;;  %1827 = vmatpush1.bf16.msra.mxu1 %v3604_v30 }
 0x444   :  { %1787 = vmatprep.subr.bf16.mxu0 %v3611_v33  ;;  %1828 = vmatprep.subr.bf16.mxu1 %v3628_v38 }
 0x447   :  { %1788 = vmatpush1.bf16.msra.mxu0 %v3618_v36  ;;  %1829 = vmatpush1.bf16.msra.mxu1 %v3623_v37 }
 0x448   :  { %1789 = vmatprep.subr.bf16.mxu0 %v3634_v39  ;;  %1830 = vmatprep.subr.bf16.mxu1 %v3639_v40 }
 0x44b   :  { %1790 = vmatpush1.bf16.msra.mxu0 %v3647_v41  ;;  %1831 = vmatpush1.bf16.msra.mxu1 %v3652_v42 }
 0x44c   :  { %1791 = vmatprep.subr.bf16.mxu0 %v3659_v1  ;;  %1832 = vmatprep.subr.bf16.mxu1 %v3664_v3 }
 0x44f   :  { %1792 = vmatpush1.bf16.msra.mxu0 %v3671_v4  ;;  %1833 = vmatpush1.bf16.msra.mxu1 %v3676_v5 }
 0x450   :  { %2087 = vmatprep.subr.bf16.mxu0 %v3493_v47  ;;  %2128 = vmatprep.subr.bf16.mxu1 %v3498_v48 }
 0x505   :  { %v1501_v13 = vpop.f32.mrb[16].mxu0  ;;  %v1542_v14 = vpop.f32.mrb[16].mxu1 }
 0x506   :  { %v1549_v15 = vadd.f32 %v2688_v35, %v1501_v13  ;;  %v1503_v16 = vpop.f32.mrb[17].mxu0  ;;  %v1544_v17 = vpop.f32.mrb[17].mxu1  ;;  %v1551_v29 = vadd.f32 %v2690_v27, %v1542_v14  ;;  %v2731_v27 = vld [vmem:[%s3884_s0 + $0xb8] sm:$0xff] }
 0x507   :  { %v1550_v18 = vadd.f32 %v2689_v12, %v1503_v16  ;;  %v1505_v19 = vpop.f32.mrb[18].mxu0  ;;  %v1546_v20 = vpop.f32.mrb[18].mxu1  ;;  %v1552_v26 = vadd.f32 %v2691_v25, %v1544_v17  ;;  %v2729_v16 = vld [vmem:[%s3884_s0 + $0xa8] sm:$0xff] }
 0x508   :  { %v2724_v21 = vmul.f32 -1.442695, %v1549_v15  ;;  %v1506_v22 = vpop.f32.mrb[19].mxu0  ;;  %v1547_v23 = vpop.f32.mrb[19].mxu1 }
 0x509   :  { %v2725_v24 = vmul.f32 -1.442695, %v1550_v18  ;;  %v2726_v28 = vmul.f32 -1.442695, %v1552_v26 }
 0x50a   :  { %3010 = vpow2.f32 %v2724_v21 }
 0x50b   :  { %3012 = vpow2.f32 %v2725_v24 }
 0x50c   :  { %3014 = vpow2.f32 %v2726_v28 }
 0x50d   :  { %3016 = vtanh.f32 %v1551_v29  ;;  %v2730_v29 = vld [vmem:[%s3884_s0 + $0xb0] sm:$0xff] }
 0x514   :  { %v3011_v31 = vpop.eup %3010 }
 0x515   :  { %v3013_v32 = vpop.eup %3012  ;;  %v1556_v34 = vadd.f32 1.0, %v3011_v31 }
 0x516   :  { %v1562_v43 = vadd.f32 1.0, %v3013_v32  ;;  %v3015_v44 = vpop.eup %3014 }
 0x517   :  { %3018 = vrcp.f32 %v1556_v34  ;;  %v3017_v45 = vpop.eup %3016  ;;  %v1569_v10 = vadd.f32 1.0, %v3015_v44 }
 0x518   :  { %3020 = vrcp.f32 %v1562_v43 }
 0x519   :  { %3022 = vrcp.f32 %v1569_v10 }
 0x521   :  { %v3019_v46 = vpop.eup %3018 }
 0x522   :  { %v3021_v8 = vpop.eup %3020  ;;  %v1573_v9 = vmul.f32 %v3019_v46, %v3017_v45 }
 0x523   :  { %v1572_v11 = vmul.f32 %v3021_v8, %v3697_v7  ;;  %v3023_v12 = vpop.eup %3022  ;;  %v2728_v7 = vld [vmem:[%s3884_s0 + $0xa0] sm:$0xff] }
 0x525   :  { %v3750_v35 = vadd.f32 %v1573_v9, %v1572_v11 }
 0x527   :  { %3024 = vtanh.f32 %v3750_v35 }
 0x531   :  { %v3025_v13 = vpop.eup %3024 }
 0x532   :  { %v1576_v14 = vmul.f32 %v3025_v13, %v3023_v12 }
 0x534   :  { %2727 = vst [vmem:[%s3888_s4 + $0x20] sm:$0xff] %v1576_v14  ;;  %v1584_v15 = vpack.c.bf16 %v1576_v14, %v1576_v14 }
 0x536   :  { %1810 = vmatmul.mubr.bf16.vlgmr.msra.gmra.mrb[20].mxu0 %v1584_v15  ;;  %1851 = vmatmul.mubr.bf16.vlgmr.msra.gmra.mrb[20].mxu1 %v1584_v15 }
 0x537   :  { %2088 = vmatpush1.bf16.msra.mxu0 %v3503_v49  ;;  %2129 = vmatpush1.bf16.msra.mxu1 %v3508_v50 }
 0x538   :  { %2089 = vmatprep.subr.bf16.mxu0 %v3517_v0  ;;  %2130 = vmatprep.subr.bf16.mxu1 %v3522_v51 }
 0x539   :  { %2119 = vmatprep.mubr.bf16.mxu0 %v3098_v2  ;;  %2160 = vmatprep.mubr.bf16.mxu1 %v3098_v2 }
 0x53b   :  { %2090 = vmatpush1.bf16.msra.mxu0 %v3527_v6  ;;  %2131 = vmatpush1.bf16.msra.mxu1 %v3532_v52 }
 0x53c   :  { %2091 = vmatprep.subr.bf16.mxu0 %v3541_v53  ;;  %2132 = vmatprep.subr.bf16.mxu1 %v3546_v54 }
 0x53f   :  { %2092 = vmatpush1.bf16.msra.mxu0 %v3551_v55  ;;  %2133 = vmatpush1.bf16.msra.mxu1 %v3556_v56 }
 0x540   :  { %2093 = vmatprep.subr.bf16.mxu0 %v3565_v57  ;;  %2134 = vmatprep.subr.bf16.mxu1 %v3570_v58 }
 0x543   :  { %2094 = vmatpush1.bf16.msra.mxu0 %v3575_v59  ;;  %2135 = vmatpush1.bf16.msra.mxu1 %v3580_v60 }
 0x544   :  { %2095 = vmatprep.subr.bf16.mxu0 %v3589_v61  ;;  %2136 = vmatprep.subr.bf16.mxu1 %v3594_v62 }
 0x547   :  { %2096 = vmatpush1.bf16.msra.mxu0 %v3599_v63  ;;  %2137 = vmatpush1.bf16.msra.mxu1 %v3604_v30 }
 0x548   :  { %2097 = vmatprep.subr.bf16.mxu0 %v3611_v33  ;;  %2138 = vmatprep.subr.bf16.mxu1 %v3628_v38 }
 0x54b   :  { %2098 = vmatpush1.bf16.msra.mxu0 %v3618_v36  ;;  %2139 = vmatpush1.bf16.msra.mxu1 %v3623_v37 }
 0x54c   :  { %2099 = vmatprep.subr.bf16.mxu0 %v3634_v39  ;;  %2140 = vmatprep.subr.bf16.mxu1 %v3639_v40 }
 0x54f   :  { %2100 = vmatpush1.bf16.msra.mxu0 %v3647_v41  ;;  %2141 = vmatpush1.bf16.msra.mxu1 %v3652_v42 }
 0x550   :  { %2101 = vmatprep.subr.bf16.mxu0 %v3659_v1  ;;  %2142 = vmatprep.subr.bf16.mxu1 %v3664_v3 }
 0x553   :  { %2102 = vmatpush1.bf16.msra.mxu0 %v3671_v4  ;;  %2143 = vmatpush1.bf16.msra.mxu1 %v3676_v5 }
 0x554   :  { %2397 = vmatprep.subr.bf16.mxu0 %v3493_v47  ;;  %2438 = vmatprep.subr.bf16.mxu1 %v3498_v48 }
 0x609   :  { %v1811_v17 = vpop.f32.mrb[20].mxu0  ;;  %v1852_v18 = vpop.f32.mrb[20].mxu1 }
 0x60a   :  { %v1859_v19 = vadd.f32 %v2728_v7, %v1811_v17  ;;  %v1813_v20 = vpop.f32.mrb[21].mxu0  ;;  %v1854_v21 = vpop.f32.mrb[21].mxu1  ;;  %v1861_v32 = vadd.f32 %v2730_v29, %v1852_v18 }
 0x60b   :  { %v1860_v22 = vadd.f32 %v2729_v16, %v1813_v20  ;;  %v1815_v23 = vpop.f32.mrb[22].mxu0  ;;  %v1856_v24 = vpop.f32.mrb[22].mxu1  ;;  %v1862_v28 = vadd.f32 %v2731_v27, %v1854_v21  ;;  %v2808_v21 = vld [vmem:[%s3884_s0 + $0xe0] sm:$0xff] }
 0x60c   :  { %v2764_v25 = vmul.f32 -1.442695, %v1859_v19  ;;  %v1816_v47 = vpop.f32.mrb[23].mxu0  ;;  %v1857_v26 = vpop.f32.mrb[23].mxu1 }
 0x60d   :  { %v2765_v48 = vmul.f32 -1.442695, %v1860_v22  ;;  %v2766_v31 = vmul.f32 -1.442695, %v1862_v28  ;;  %v2809_v22 = vld [vmem:[%s3884_s0 + $0xe8] sm:$0xff] }
 0x60e   :  { %3026 = vpow2.f32 %v2764_v25 }
 0x60f   :  { %3028 = vpow2.f32 %v2765_v48 }
 0x610   :  { %3030 = vpow2.f32 %v2766_v31 }
 0x611   :  { %3032 = vtanh.f32 %v1861_v32 }
 0x618   :  { %v3027_v34 = vpop.eup %3026 }
 0x619   :  { %v3029_v43 = vpop.eup %3028  ;;  %v1866_v44 = vadd.f32 1.0, %v3027_v34 }
 0x61a   :  { %v1872_v45 = vadd.f32 1.0, %v3029_v43  ;;  %v3031_v46 = vpop.eup %3030  ;;  %v2811_v43 = vld [vmem:[%s3884_s0 + $0xf8] sm:$0xff] }
 0x61b   :  { %3034 = vrcp.f32 %v1866_v44  ;;  %v3033_v8 = vpop.eup %3032  ;;  %v1879_v12 = vadd.f32 1.0, %v3031_v46 }
 0x61c   :  { %3036 = vrcp.f32 %v1872_v45  ;;  %v2810_v45 = vld [vmem:[%s3884_s0 + $0xf0] sm:$0xff] }
 0x61d   :  { %3038 = vrcp.f32 %v1879_v12 }
 0x625   :  { %v3035_v9 = vpop.eup %3034 }
 0x626   :  { %v3037_v10 = vpop.eup %3036  ;;  %v1883_v11 = vmul.f32 %v3035_v9, %v3033_v8 }
 0x627   :  { %v1882_v13 = vmul.f32 %v3037_v10, %v3750_v35  ;;  %v3039_v15 = vpop.eup %3038 }
 0x629   :  { %v3803_v14 = vadd.f32 %v1883_v11, %v1882_v13 }
 0x62b   :  { %3040 = vtanh.f32 %v3803_v14 }
 0x635   :  { %v3041_v7 = vpop.eup %3040 }
 0x636   :  { %v1886_v16 = vmul.f32 %v3041_v7, %v3039_v15 }
 0x638   :  { %2767 = vst [vmem:[%s3888_s4 + $0x28] sm:$0xff] %v1886_v16  ;;  %v1894_v17 = vpack.c.bf16 %v1886_v16, %v1886_v16 }
 0x63a   :  { %2120 = vmatmul.mubr.bf16.vlgmr.msra.gmra.mrb[24].mxu0 %v1894_v17  ;;  %2161 = vmatmul.mubr.bf16.vlgmr.msra.gmra.mrb[24].mxu1 %v1894_v17 }
 0x63b   :  { %2398 = vmatpush1.bf16.msra.mxu0 %v3503_v49  ;;  %2439 = vmatpush1.bf16.msra.mxu1 %v3508_v50  ;;  %v2769_v49 = vld [vmem:[%s3884_s0 + $0xc8] sm:$0xff] }
 0x63c   :  { %2399 = vmatprep.subr.bf16.mxu0 %v3517_v0  ;;  %2440 = vmatprep.subr.bf16.mxu1 %v3522_v51 }
 0x63d   :  { %2429 = vmatprep.mubr.bf16.mxu0 %v3098_v2  ;;  %2470 = vmatprep.mubr.bf16.mxu1 %v3098_v2  ;;  %v2768_v2 = vld [vmem:[%s3884_s0 + $0xc0] sm:$0xff] }
 0x63f   :  { %2400 = vmatpush1.bf16.msra.mxu0 %v3527_v6  ;;  %2441 = vmatpush1.bf16.msra.mxu1 %v3532_v52 }
 0x640   :  { %2401 = vmatprep.subr.bf16.mxu0 %v3541_v53  ;;  %2442 = vmatprep.subr.bf16.mxu1 %v3546_v54 }
 0x643   :  { %2402 = vmatpush1.bf16.msra.mxu0 %v3551_v55  ;;  %2443 = vmatpush1.bf16.msra.mxu1 %v3556_v56 }
 0x644   :  { %2403 = vmatprep.subr.bf16.mxu0 %v3565_v57  ;;  %2444 = vmatprep.subr.bf16.mxu1 %v3570_v58 }
 0x647   :  { %2404 = vmatpush1.bf16.msra.mxu0 %v3575_v59  ;;  %2445 = vmatpush1.bf16.msra.mxu1 %v3580_v60  ;;  %v2771_v60 = vld [vmem:[%s3884_s0 + $0xd8] sm:$0xff] }
 0x648   :  { %2405 = vmatprep.subr.bf16.mxu0 %v3589_v61  ;;  %2446 = vmatprep.subr.bf16.mxu1 %v3594_v62  ;;  %v2770_v62 = vld [vmem:[%s3884_s0 + $0xd0] sm:$0xff]  ;;  %s3074_s0 = scalar_lea.vmem %s2524_s16, 128 }
 0x649   :  { %p3075_p0 = scmp.ne.s32.totalorder %s2524_s16, %s3074_s0  ;;  %p3080_p2 = scmp.lt.s32.totalorder %s3074_s0, %s3074_s0 }
 0x64b   :  { %2406 = vmatpush1.bf16.msra.mxu0 %v3599_v63  ;;  %2447 = vmatpush1.bf16.msra.mxu1 %v3604_v30  ;;  %p3081_p3 = por %p3080_p2, %p3079_p1 }
 0x64c   :  { %2407 = vmatprep.subr.bf16.mxu0 %v3611_v33  ;;  %2448 = vmatprep.subr.bf16.mxu1 %v3628_v38 }
 0x64d   :  { %p3082_p4 = pnand %p3081_p3, %p3075_p0 }
 0x64f   :  { %2408 = vmatpush1.bf16.msra.mxu0 %v3618_v36  ;;  %2449 = vmatpush1.bf16.msra.mxu1 %v3623_v37 }
 0x650   :  { %2409 = vmatprep.subr.bf16.mxu0 %v3634_v39  ;;  %2450 = vmatprep.subr.bf16.mxu1 %v3639_v40 }
 0x653   :  { %2410 = vmatpush1.bf16.msra.mxu0 %v3647_v41  ;;  %2451 = vmatpush1.bf16.msra.mxu1 %v3652_v42 }
 0x654   :  { %2411 = vmatprep.subr.bf16.mxu0 %v3659_v1  ;;  %2452 = vmatprep.subr.bf16.mxu1 %v3664_v3 }
 0x657   :  { %2412 = vmatpush1.bf16.msra.mxu0 %v3671_v4  ;;  %2453 = vmatpush1.bf16.msra.mxu1 %v3676_v5 }
 0x70d   :  { %v2121_v50 = vpop.f32.mrb[24].mxu0  ;;  %v2162_v0 = vpop.f32.mrb[24].mxu1 }
 0x70e   :  { %v2169_v51 = vadd.f32 %v2768_v2, %v2121_v50  ;;  %v2123_v6 = vpop.f32.mrb[25].mxu0  ;;  %v2164_v52 = vpop.f32.mrb[25].mxu1  ;;  %v2171_v30 = vadd.f32 %v2770_v62, %v2162_v0 }
 0x70f   :  { %v2170_v53 = vadd.f32 %v2769_v49, %v2123_v6  ;;  %v2125_v54 = vpop.f32.mrb[26].mxu0  ;;  %v2166_v55 = vpop.f32.mrb[26].mxu1  ;;  %v2172_v61 = vadd.f32 %v2771_v60, %v2164_v52 }
 0x710   :  { %v2804_v56 = vmul.f32 -1.442695, %v2169_v51  ;;  %v2126_v57 = vpop.f32.mrb[27].mxu0  ;;  %v2167_v58 = vpop.f32.mrb[27].mxu1 }
 0x711   :  { %v2805_v59 = vmul.f32 -1.442695, %v2170_v53  ;;  %v2806_v63 = vmul.f32 -1.442695, %v2172_v61 }
 0x712   :  { %3042 = vpow2.f32 %v2804_v56 }
 0x713   :  { %3044 = vpow2.f32 %v2805_v59 }
 0x714   :  { %3046 = vpow2.f32 %v2806_v63 }
 0x715   :  { %3048 = vtanh.f32 %v2171_v30 }
 0x71c   :  { %v3043_v33 = vpop.eup %3042 }
 0x71d   :  { %v3045_v36 = vpop.eup %3044  ;;  %v2176_v37 = vadd.f32 1.0, %v3043_v33 }
 0x71e   :  { %v2182_v38 = vadd.f32 1.0, %v3045_v36  ;;  %v3047_v39 = vpop.eup %3046 }
 0x71f   :  { %3050 = vrcp.f32 %v2176_v37  ;;  %v3049_v40 = vpop.eup %3048  ;;  %v2189_v3 = vadd.f32 1.0, %v3047_v39 }
 0x720   :  { %3052 = vrcp.f32 %v2182_v38 }
 0x721   :  { %3054 = vrcp.f32 %v2189_v3 }
 0x729   :  { %v3051_v41 = vpop.eup %3050 }
 0x72a   :  { %v3053_v42 = vpop.eup %3052  ;;  %v2193_v1 = vmul.f32 %v3051_v41, %v3049_v40 }
 0x72b   :  { %v2192_v4 = vmul.f32 %v3053_v42, %v3803_v14  ;;  %v3055_v35 = vpop.eup %3054 }
 0x72d   :  { %v2194_v5 = vadd.f32 %v2193_v1, %v2192_v4 }
 0x72f   :  { %3056 = vtanh.f32 %v2194_v5 }
 0x739   :  { %v3057_v18 = vpop.eup %3056 }
 0x73a   :  { %v2196_v19 = vmul.f32 %v3057_v18, %v3055_v35 }
 0x73c   :  { %2807 = vst [vmem:[%s3888_s4 + $0x30] sm:$0xff] %v2196_v19  ;;  %v2204_v20 = vpack.c.bf16 %v2196_v19, %v2196_v19 }
 0x73e   :  { %2430 = vmatmul.mubr.bf16.vlgmr.msra.gmra.mrb[28].mxu0 %v2204_v20  ;;  %2471 = vmatmul.mubr.bf16.vlgmr.msra.gmra.mrb[28].mxu1 %v2204_v20 }
 0x811   :  { %v2431_v23 = vpop.f32.mrb[28].mxu0  ;;  %v2472_v24 = vpop.f32.mrb[28].mxu1 }
 0x812   :  { %v2479_v25 = vadd.f32 %v2808_v21, %v2431_v23  ;;  %v2433_v47 = vpop.f32.mrb[29].mxu0  ;;  %v2474_v26 = vpop.f32.mrb[29].mxu1  ;;  %v2481_v8 = vadd.f32 %v2810_v45, %v2472_v24 }
 0x813   :  { %v2480_v48 = vadd.f32 %v2809_v22, %v2433_v47  ;;  %v2435_v27 = vpop.f32.mrb[30].mxu0  ;;  %v2476_v28 = vpop.f32.mrb[30].mxu1  ;;  %v2482_v44 = vadd.f32 %v2811_v43, %v2474_v26 }
 0x814   :  { %v2844_v29 = vmul.f32 -1.442695, %v2479_v25  ;;  %v2436_v31 = vpop.f32.mrb[31].mxu0  ;;  %v2477_v32 = vpop.f32.mrb[31].mxu1 }
 0x815   :  { %v2845_v34 = vmul.f32 -1.442695, %v2480_v48  ;;  %v2846_v46 = vmul.f32 -1.442695, %v2482_v44 }
 0x816   :  { %3058 = vpow2.f32 %v2844_v29 }
 0x817   :  { %3060 = vpow2.f32 %v2845_v34 }
 0x818   :  { %3062 = vpow2.f32 %v2846_v46 }
 0x819   :  { %3064 = vtanh.f32 %v2481_v8 }
 0x820   :  { %v3059_v9 = vpop.eup %3058 }
 0x821   :  { %v3061_v10 = vpop.eup %3060  ;;  %v2486_v11 = vadd.f32 1.0, %v3059_v9 }
 0x822   :  { %v2492_v12 = vadd.f32 1.0, %v3061_v10  ;;  %v3063_v13 = vpop.eup %3062 }
 0x823   :  { %3066 = vrcp.f32 %v2486_v11  ;;  %v3065_v14 = vpop.eup %3064  ;;  %v2499_v16 = vadd.f32 1.0, %v3063_v13 }
 0x824   :  { %3068 = vrcp.f32 %v2492_v12 }
 0x825   :  { %3070 = vrcp.f32 %v2499_v16 }
 0x82d   :  { %v3067_v15 = vpop.eup %3066 }
 0x82e   :  { %v3069_v7 = vpop.eup %3068  ;;  %v2503_v17 = vmul.f32 %v3067_v15, %v3065_v14 }
 0x82f   :  { %v2502_v2 = vmul.f32 %v3069_v7, %v2194_v5 }
 0x831   :  { %v2504_v49 = vadd.f32 %v2503_v17, %v2502_v2 }
 0x833   :  { %3072 = vtanh.f32 %v2504_v49  ;;  %2514 = vst [vmem:[#allocation4] sm:$0xff] %v2504_v49 }
 0x834   :  { %3085 = shalt.err (!%p3082_p4)
}
 0x835   :  { %s3086_s19 = scalar_lea.hbm %s3889_s5, 128 }
 0x836   :  { %p3087_p5 = scmp.ne.s32.totalorder %s3889_s5, %s3086_s19  ;;  %p3090_p6 = scmp.lt.u32.totalorder %s3086_s19, %s3889_s5 }
 0x838   :  { %p3092_p7 = pnand %p3090_p6, %p3087_p5 }
 0x83a   :  { %3095 = shalt.err (!%p3092_p7)
}
 0x83b   :  { %2526 = dma.vmem_to_hbm [thread:$0]  %s2524_s16, 128, %s3889_s5, [#allocation5]   ;;  %v3071_v50 = vpop.eup %3070 }
 0x83d   :  { %v3073_v0 = vpop.eup %3072 }
 0x83e   :  { %v2506_v51 = vmul.f32 %v3073_v0, %v3071_v50 }
 0x840   :  { %2847 = vst [vmem:[%s3888_s4 + $0x38] sm:$0xff] %v2506_v51 }
 0x841   :  { %3096 = dma.done.wait [#allocation5], 128  }
 0x842   :  { %3097 = vsyncadd [#allocation5], 4294967168 }
 0x843   :  { %2532 = vsyncpa [#allocation5], 1 }

</bundles_post_ra>
